<compile_context>
chip_gen: v7x
topology: tpu7x:2x2x1
jax: 0.10.0
libtpu: 0.0.40
codegen_flags: <defaults>
</compile_context>

<pallas_src>
import functools

import numpy as np
import jax
import jax.numpy as jnp
from jax.experimental import pallas as pl
from jax.experimental.pallas import tpu as pltpu

LAMBDA_OPACITY = 1e-3
LAMBDA_DISTORTION = 1e-3

_LANE = 128          # lane width
_EW_ROWS = 512       # elementwise block (512, 128) f32 = 256 KiB / buffer
_RAY_BLOCK = 256     # rays per distortion grid step


def _round_up(x, m):
    return (x + m - 1) // m * m


# ----------------------------- kernels ------------------------------------- #
def _rgb_opacity_kernel(rgb_ref, tgt_ref, op_ref, rgb_out_ref, op_out_ref, *, lam_o):
    x = rgb_ref[...].astype(jnp.float32)
    y = tgt_ref[...].astype(jnp.float32)
    d = x - y
    rgb_out_ref[...] = d * d
    o = op_ref[...].astype(jnp.float32) + 1e-10
    op_out_ref[...] = lam_o * (-o * jnp.log(o))


def _distortion_kernel(w_ref, t_ref, d_ref, loss_ref, *, lam_d):
    w = w_ref[...].astype(jnp.float32)        # (RB, S)
    t = t_ref[...].astype(jnp.float32)        # (RB, S)
    delta = d_ref[...].astype(jnp.float32)    # (RB, S)

    # Per-ray centering: the loss only depends on t_i - t_j, so shifting each
    # ray by its first sample's t is exact and removes the cancellation in
    # t_i*W_< - (wt)_< that would otherwise make bf16 MXU inputs unsafe.
    # Padded samples / rays carry w = 0, so they contribute nothing.
    t = t - t[:, 0:1]
    wt = w * t

    s = w.shape[1]
    row = jax.lax.broadcasted_iota(jnp.int32, (s, s), 0)
    col = jax.lax.broadcasted_iota(jnp.int32, (s, s), 1)
    tri = (row < col).astype(jnp.bfloat16)    # tri[j, i] = 1 iff j < i

    # exclusive prefix sums along the sample (lane) axis via one MXU matmul each
    w_ex = jnp.dot(w.astype(jnp.bfloat16), tri, preferred_element_type=jnp.float32)
    wt_ex = jnp.dot(wt.astype(jnp.bfloat16), tri, preferred_element_type=jnp.float32)

    # sum_{i!=j} w_i w_j |t_i - t_j| == 2 sum_i w_i (t_i W_<i - (wt)_<i)  (t sorted)
    bi = 2.0 * jnp.sum(w * (t * w_ex - wt_ex), axis=1)            # (RB,)
    uni = (1.0 / 3.0) * jnp.sum(w * w * delta, axis=1)            # (RB,)
    loss_ref[0, :] = lam_d * (bi + uni)                           # lane-dense row store


# ----------------------------- wrappers ------------------------------------ #
def rgb_opacity_loss(rgb, tgt, opacity, lam_o):
    """Fused rgb squared-error + opacity entropy loss in one pallas_call."""
    n_rgb = int(np.prod(rgb.shape))
    n_op = int(np.prod(opacity.shape))
    blk = _EW_ROWS * _LANE
    n_pad = max(_round_up(max(n_rgb, n_op), blk), blk)

    def prep(a, n, pv):
        flat = a.reshape(-1)
        if n_pad != n:
            flat = jnp.pad(flat, (0, n_pad - n), constant_values=pv)
        return flat.reshape(n_pad // _LANE, _LANE)

    rgb_p = prep(rgb, n_rgb, 0.0)
    tgt_p = prep(tgt, n_rgb, 0.0)
    op_p = prep(opacity, n_op, 1.0)          # -(1)*log(1) == 0 for padding
    rows = n_pad // _LANE

    spec = pl.BlockSpec((_EW_ROWS, _LANE), lambda i: (i, 0))
    rgb_sq, op_l = pl.pallas_call(
        functools.partial(_rgb_opacity_kernel, lam_o=lam_o),
        out_shape=(jax.ShapeDtypeStruct((rows, _LANE), jnp.float32),
                   jax.ShapeDtypeStruct((rows, _LANE), jnp.float32)),
        grid=(rows // _EW_ROWS,),
        in_specs=[spec, spec, spec],
        out_specs=[spec, spec],
        compiler_params=pltpu.CompilerParams(dimension_semantics=("parallel",)),
    )(rgb_p, tgt_p, op_p)

    rgb_out = rgb_sq.reshape(-1)[:n_rgb].reshape(rgb.shape)
    op_out = op_l.reshape(-1)[:n_op].reshape(opacity.shape)
    return rgb_out, op_out


def distortion_loss(ws, deltas, ts, rays_a, lam_d, *,
                    max_samples=None, uniform_samples=None, rays_are_identity=None):
    """Mip-NeRF-360 distortion loss per ray (vren.distortion_loss_fw semantics).

    Under jit (rays_a traced) `max_samples` must be supplied; optionally pass
    `uniform_samples` (fixed, contiguous samples/ray) and `rays_are_identity`
    as static hints to skip the XLA gather / scatter.
    """
    R = rays_a.shape[0]

    # Static (host-side) inspection only when rays_a is concrete.
    ra_np = None
    try:
        ra_np = np.asarray(jax.device_get(rays_a)).astype(np.int64)
    except Exception:
        ra_np = None   # traced under jit

    if max_samples is None:
        if ra_np is None:
            raise ValueError("distortion_loss: pass max_samples when rays_a is traced.")
        max_samples = int(ra_np[:, 2].max()) if R > 0 else 1

    if ra_np is not None:
        if rays_are_identity is None:
            rays_are_identity = bool(np.array_equal(ra_np[:, 0], np.arange(R)))
        if uniform_samples is None and R > 0:
            s0 = int(ra_np[0, 2])
            if (s0 > 0
                    and np.all(ra_np[:, 2] == s0)
                    and np.array_equal(ra_np[:, 1], np.arange(R) * s0)
                    and R * s0 == int(ws.shape[0])):
                uniform_samples = s0
    if rays_are_identity is None:
        rays_are_identity = False

    S_pad = max(_round_up(int(max_samples), _LANE), _LANE)
    rb = min(_RAY_BLOCK, max(_round_up(R, 16), 16))
    R_pad = max(_round_up(R, rb), rb)

    if uniform_samples is not None:
        s0 = int(uniform_samples)

        def prep(x):                       # contiguous uniform layout: just reshape
            x2 = x.reshape(R, s0)
            if S_pad != s0:
                x2 = jnp.pad(x2, ((0, 0), (0, S_pad - s0)))
            return x2
        w_pad, d_pad, t_pad = prep(ws), prep(deltas), prep(ts)
    else:
        starts = rays_a[:, 1].astype(jnp.int32)
        counts = rays_a[:, 2].astype(jnp.int32)
        lane = jnp.arange(S_pad, dtype=jnp.int32)
        idx = starts[:, None] + lane[None, :]
        valid = lane[None, :] < counts[:, None]
        idx = jnp.where(valid, idx, 0)

        def gather(x):                     # keep native dtype (no HBM-side upcast)
            return jnp.where(valid, x[idx], jnp.zeros((), x.dtype))
        w_pad, d_pad, t_pad = gather(ws), gather(deltas), gather(ts)

    if R_pad != R:
        padR = lambda x: jnp.pad(x, ((0, R_pad - R), (0, 0)))
        w_pad, d_pad, t_pad = padR(w_pad), padR(d_pad), padR(t_pad)

    # VMEM budget derived from actual buffer sizes (inputs double-buffered by
    # the BlockSpec pipeline) with headroom, capped at the chip's capacity.
    in_bytes = jnp.dtype(w_pad.dtype).itemsize
    pipeline_bytes = 2 * (3 * rb * S_pad * in_bytes + rb * 4)
    compute_bytes = 8 * rb * S_pad * 4 + 2 * S_pad * S_pad
    want = int(1.5 * (pipeline_bytes + compute_bytes))
    try:
        cap = int(pltpu.get_tpu_info().vmem_capacity_bytes)
    except Exception:
        cap = 64 * 1024 * 1024
    vmem_limit = int(min(cap, max(32 * 1024 * 1024, want)))

    ray_spec = pl.BlockSpec((rb, S_pad), lambda i: (i, 0))
    loss_row = pl.pallas_call(
        functools.partial(_distortion_kernel, lam_d=lam_d),
        out_shape=jax.ShapeDtypeStruct((1, R_pad), jnp.float32),
        grid=(R_pad // rb,),
        in_specs=[ray_spec, ray_spec, ray_spec],
        out_specs=pl.BlockSpec((1, rb), lambda i: (0, i)),
        compiler_params=pltpu.CompilerParams(
            dimension_semantics=("parallel",),
            vmem_limit_bytes=vmem_limit),
    )(w_pad, t_pad, d_pad)

    loss = loss_row[0, :R]
    if rays_are_identity:
        return loss
    ray_idx = rays_a[:, 0].astype(jnp.int32)
    return jnp.zeros((R,), jnp.float32).at[ray_idx].set(loss)


def nerf_loss(results, target,
              lambda_opacity=LAMBDA_OPACITY, lambda_distortion=LAMBDA_DISTORTION,
              max_samples_per_ray=None):
    d = {}
    d['rgb'], d['opacity'] = rgb_opacity_loss(
        results['rgb'], target['rgb'], results['opacity'], lambda_opacity)
    if lambda_distortion > 0:
        d['distortion'] = distortion_loss(
            results['ws'], results['deltas'], results['ts'], results['rays_a'],
            lambda_distortion, max_samples=max_samples_per_ray)
    return d


# ------------------------------- main --------------------------------------- #
if __name__ == "__main__":
    N_rays, S = 8, 16
    N = N_rays * S

    key = jax.random.PRNGKey(0)
    k = jax.random.split(key, 9)
    rgb_pred = jax.random.uniform(k[0], (N_rays, 3), jnp.float32)
    rgb_tgt = jax.random.uniform(k[1], (N_rays, 3), jnp.float32)
    opacity = jax.random.uniform(k[2], (N_rays, 1), jnp.float32, 1e-3, 1.0)
    ws = jax.random.uniform(k[3], (N,), jnp.float32) * 0.1
    deltas = jax.random.uniform(k[4], (N,), jnp.float32) * 0.02 + 1e-3
    # ts sorted within each ray segment (as NeRF sample midpoints are)
    ts = jnp.sort(jax.random.uniform(k[5], (N_rays, S), jnp.float32), axis=1).reshape(-1)
    rays_a = jnp.stack([jnp.arange(N_rays, dtype=jnp.int32),
                        jnp.arange(N_rays, dtype=jnp.int32) * S,
                        jnp.full((N_rays,), S, jnp.int32)], axis=1)

    results = dict(rgb=rgb_pred, opacity=opacity, ws=ws, deltas=deltas, ts=ts,
                   rays_a=rays_a)
    target = dict(rgb=rgb_tgt)

    d = nerf_loss(results, target)
    jax.block_until_ready(d)

    # pure-numpy references
    ref_rgb = np.asarray(rgb_pred - rgb_tgt) ** 2
    o = np.asarray(opacity) + 1e-10
    ref_op = LAMBDA_OPACITY * (-o * np.log(o))

    def dist_ref(ws_, deltas_, ts_, rays_a_):
        ra = np.asarray(rays_a_)
        wsn, dn, tn = map(np.asarray, (ws_, deltas_, ts_))
        out = np.zeros(ra.shape[0], np.float64)
        for r in range(ra.shape[0]):
            ridx, s, n = int(ra[r, 0]), int(ra[r, 1]), int(ra[r, 2])
            w, t, dl = wsn[s:s + n], tn[s:s + n], dn[s:s + n]
            bi = np.sum(w[:, None] * w[None, :] * np.abs(t[:, None] - t[None, :]))
            uni = np.sum(w * w * dl) / 3.0
            out[ridx] = bi + uni
        return LAMBDA_DISTORTION * out

    np.testing.assert_allclose(np.asarray(d['rgb']), ref_rgb, rtol=1e-5, atol=1e-6)
    np.testing.assert_allclose(np.asarray(d['opacity']), ref_op, rtol=1e-5, atol=1e-6)
    # bf16 MXU inputs (f32 accumulate) bound the relative error to ~1e-3
    np.testing.assert_allclose(np.asarray(d['distortion']),
                               dist_ref(ws, deltas, ts, rays_a),
                               rtol=5e-3, atol=1e-7)

    # ragged counts + permuted ray order: exercises the gather + scatter paths
    counts2 = np.array([16, 9, 12, 16, 5, 16, 8, 14], np.int32)
    starts2 = np.concatenate([[0], np.cumsum(counts2)[:-1]]).astype(np.int32)
    N2 = int(counts2.sum())
    ws2 = jax.random.uniform(k[6], (N2,), jnp.float32) * 0.1
    deltas2 = jax.random.uniform(k[7], (N2,), jnp.float32) * 0.02 + 1e-3
    t_raw = jax.random.uniform(k[8], (N2,), jnp.float32)
    ts2 = jnp.concatenate([jnp.sort(t_raw[int(s):int(s) + int(c)])
                           for s, c in zip(starts2, counts2)])
    ray_idx2 = np.arange(len(counts2), dtype=np.int32)[::-1].copy()
    rays_a2 = jnp.asarray(np.stack([ray_idx2, starts2, counts2], axis=1).astype(np.int32))

    dist2 = distortion_loss(ws2, deltas2, ts2, rays_a2, LAMBDA_DISTORTION)
    jax.block_until_ready(dist2)
    np.testing.assert_allclose(np.asarray(dist2),
                               dist_ref(ws2, deltas2, ts2, rays_a2),
                               rtol=5e-3, atol=1e-7)

    print("KERNEL_OK")
</pallas_src>

<mosaic_0001>
module attributes {stable_mosaic.version = 11 : i64} {
  func.func @_rgb_opacity_kernel(%arg0: i32, %arg1: memref<512x128xf32, #tpu.memory_space<vmem>>, %arg2: memref<512x128xf32, #tpu.memory_space<vmem>>, %arg3: memref<512x128xf32, #tpu.memory_space<vmem>>, %arg4: memref<512x128xf32, #tpu.memory_space<vmem>>, %arg5: memref<512x128xf32, #tpu.memory_space<vmem>>) attributes {dimension_semantics = [#tpu.dimension_semantics<parallel>], iteration_bounds = array<i64: 1>, scalar_prefetch = 0 : i64, scratch_operands = 0 : i64, tpu.core_type = #tpu.core_type<tc>, window_params = [{transform_indices = @transform_0, window_bounds = array<i64: 512, 128>}, {transform_indices = @transform_1, window_bounds = array<i64: 512, 128>}, {transform_indices = @transform_2, window_bounds = array<i64: 512, 128>}, {transform_indices = @transform_3, window_bounds = array<i64: 512, 128>}, {transform_indices = @transform_4, window_bounds = array<i64: 512, 128>}]} {
    %c0 = arith.constant 0 : index
    %c0_0 = arith.constant 0 : index
    %0 = vector.load %arg1[%c0, %c0_0] : memref<512x128xf32, #tpu.memory_space<vmem>>, vector<512x128xf32>
    %c0_1 = arith.constant 0 : index
    %c0_2 = arith.constant 0 : index
    %1 = vector.load %arg2[%c0_1, %c0_2] : memref<512x128xf32, #tpu.memory_space<vmem>>, vector<512x128xf32>
    %2 = arith.subf %0, %1 : vector<512x128xf32>
    %3 = arith.mulf %2, %2 : vector<512x128xf32>
    %c0_3 = arith.constant 0 : index
    %c0_4 = arith.constant 0 : index
    %4 = vector.load %arg4[%c0_3, %c0_4] : memref<512x128xf32, #tpu.memory_space<vmem>>, vector<512x128xf32>
    tpu.vector_store %arg4[%c0_3, %c0_4], %3 {strides = array<i32>} : memref<512x128xf32, #tpu.memory_space<vmem>>, vector<512x128xf32>,
    %c0_5 = arith.constant 0 : index
    %c0_6 = arith.constant 0 : index
    %5 = vector.load %arg3[%c0_5, %c0_6] : memref<512x128xf32, #tpu.memory_space<vmem>>, vector<512x128xf32>
    %cst = arith.constant 1.000000e-10 : f32
    %6 = vector.broadcast %cst : f32 to vector<512x128xf32>
    %7 = arith.addf %5, %6 : vector<512x128xf32>
    %cst_7 = arith.constant 0.000000e+00 : f32
    %8 = vector.broadcast %cst_7 : f32 to vector<512x128xf32>
    %9 = arith.subf %8, %7 : vector<512x128xf32>
    %10 = math.log %7 : vector<512x128xf32>
    %11 = arith.mulf %9, %10 : vector<512x128xf32>
    %cst_8 = arith.constant 1.000000e-03 : f32
    %12 = vector.broadcast %cst_8 : f32 to vector<512x128xf32>
    %13 = arith.mulf %12, %11 : vector<512x128xf32>
    %c0_9 = arith.constant 0 : index
    %c0_10 = arith.constant 0 : index
    %14 = vector.load %arg5[%c0_9, %c0_10] : memref<512x128xf32, #tpu.memory_space<vmem>>, vector<512x128xf32>
    tpu.vector_store %arg5[%c0_9, %c0_10], %13 {strides = array<i32>} : memref<512x128xf32, #tpu.memory_space<vmem>>, vector<512x128xf32>,
    return
  }
  func.func @transform_0(%arg0: i32) -> (i32, i32) {
    %c0_i32 = arith.constant 0 : i32
    %c0_i32_0 = arith.constant 0 : i32
    return %arg0, %c0_i32 : i32, i32
  }
  func.func @transform_1(%arg0: i32) -> (i32, i32) {
    %c0_i32 = arith.constant 0 : i32
    %c0_i32_0 = arith.constant 0 : i32
    return %arg0, %c0_i32 : i32, i32
  }
  func.func @transform_2(%arg0: i32) -> (i32, i32) {
    %c0_i32 = arith.constant 0 : i32
    %c0_i32_0 = arith.constant 0 : i32
    return %arg0, %c0_i32 : i32, i32
  }
  func.func @transform_3(%arg0: i32) -> (i32, i32) {
    %c0_i32 = arith.constant 0 : i32
    %c0_i32_0 = arith.constant 0 : i32
    return %arg0, %c0_i32 : i32, i32
  }
  func.func @transform_4(%arg0: i32) -> (i32, i32) {
    %c0_i32 = arith.constant 0 : i32
    %c0_i32_0 = arith.constant 0 : i32
    return %arg0, %c0_i32 : i32, i32
  }
}

</mosaic_0001>

<bundles_post_ra>
// kernel: tpu_custom_call.1
= control target key start
LH: loop header
LB: loop body
LE: loop exit
PB: predicated region body
PF: predicated region fallthrough
CT: control target
= control target key end

     0   :  { %10 = vsyncpa [#allocation3], 0  ;;  %s1612_s0 = inlined_call_operand.hbm [shape: f32[512,128], index: 0, kind: input, shape index: {}]   ;;  %s1613_s1 = inlined_call_operand.hbm [shape: f32[512,128], index: 1, kind: input, shape index: {}]   ;;  %s1614_s2 = inlined_call_operand.hbm [shape: f32[512,128], index: 2, kind: input, shape index: {}]   ;;  %s1615_s3 = inlined_call_operand.hbm [shape: f32[512,128], index: 3, kind: output, shape index: {0}]   ;;  %s1616_s4 = inlined_call_operand.hbm [shape: f32[512,128], index: 4, kind: output, shape index: {1}]  }
   0x1   :  { %11 = vsyncpa [#allocation6], 0 }
   0x2   :  { %12 = vsyncpa [#allocation4], 0 }
   0x3   :  { %13 = vsyncpa [#allocation10], 0  ;;  %s1178_s15 = smov [#allocation5]   ;;  %s1179_s17 = smov [#allocation2]  }
   0x4   :  { %s31_s16 = sshll.u32 %s1178_s15, 4  ;;  %s19_s18 = sshll.u32 %s1179_s17, 4  ;;  %s32_s16 = int_to_ptr.vmem [resolvable:$true] %s31_s16  ;;  %s1210_s18 = int_to_ptr.vmem [resolvable:$true] %s19_s18 }
   0x5   :  { %s1060_s21 = scalar_lea.hbm %s1613_s1, 8192 }
   0x6   :  { %p1061_p0 = scmp.ne.s32.totalorder %s1613_s1, %s1060_s21  ;;  %p1064_p1 = scmp.lt.u32.totalorder %s1060_s21, %s1613_s1 }
   0x8   :  { %p1066_p2 = pnand %p1064_p1, %p1061_p0 }
   0xa   :  { %1069 = shalt.err (!%p1066_p2)
}
   0xb   :  { %s1070_s26 = scalar_lea.vmem %s32_s16, 8192  ;;  %p1075_p4 = scmp.lt.s32.totalorder %s32_s16, %s32_s16 }
   0xc   :  { %p1071_p3 = scmp.ne.s32.totalorder %s32_s16, %s1070_s26  ;;  %p1076_p5 = scmp.lt.s32.totalorder %s1070_s26, %s1070_s26 }
   0xe   :  { %p1077_p6 = por %p1076_p5, %p1075_p4 }
  0x10   :  { %p1078_p7 = pnand %p1077_p6, %p1071_p3 }
  0x12   :  { %1081 = shalt.err (!%p1078_p7)
}
  0x13   :  { %s1180_s27 = smov 128   ;;  %s1181_s28 = smov 8  }
  0x14   :  { %37 = dma.hbm_to_vmem [thread:$0]  %s1613_s1, 8192, %s32_s16, [#allocation6], %s1180_s27, %s1180_s27, %s1181_s28  }
  0x15   :  { %s1082_s7 = scalar_lea.hbm %s1612_s0, 8192 }
  0x16   :  { %p1083_p8 = scmp.ne.s32.totalorder %s1612_s0, %s1082_s7  ;;  %p1086_p9 = scmp.lt.u32.totalorder %s1082_s7, %s1612_s0 }
  0x18   :  { %p1088_p10 = pnand %p1086_p9, %p1083_p8 }
  0x1a   :  { %1091 = shalt.err (!%p1088_p10)
}
  0x1b   :  { %s1092_s12 = scalar_lea.vmem %s1210_s18, 8192  ;;  %p1097_p12 = scmp.lt.s32.totalorder %s1210_s18, %s1210_s18 }
  0x1c   :  { %p1093_p11 = scmp.ne.s32.totalorder %s1210_s18, %s1092_s12  ;;  %p1098_p13 = scmp.lt.s32.totalorder %s1092_s12, %s1092_s12 }
  0x1e   :  { %p1099_p0 = por %p1098_p13, %p1097_p12 }
  0x20   :  { %p1100_p1 = pnand %p1099_p0, %p1093_p11 }
  0x22   :  { %1103 = shalt.err (!%p1100_p1)
}
  0x23   :  { %25 = dma.hbm_to_vmem [thread:$0]  %s1612_s0, 8192, %s1210_s18, [#allocation3], %s1180_s27, %s1180_s27, %s1181_s28  }
  0x24   :  { %s1182_s14 = smov [#allocation7]   ;;  %s1104_s19 = scalar_lea.hbm %s1614_s2, 8192 }
  0x25   :  { %s43_s15 = sshll.u32 %s1182_s14, 4  ;;  %p1105_p2 = scmp.ne.s32.totalorder %s1614_s2, %s1104_s19  ;;  %s44_s15 = int_to_ptr.vmem [resolvable:$true] %s43_s15 }
  0x26   :  { %p1108_p3 = scmp.lt.u32.totalorder %s1104_s19, %s1614_s2 }
  0x28   :  { %p1110_p4 = pnand %p1108_p3, %p1105_p2 }
  0x2a   :  { %1113 = shalt.err (!%p1110_p4)
}
  0x2b   :  { %s1114_s24 = scalar_lea.vmem %s44_s15, 8192  ;;  %p1119_p6 = scmp.lt.s32.totalorder %s44_s15, %s44_s15 }
  0x2c   :  { %p1115_p5 = scmp.ne.s32.totalorder %s44_s15, %s1114_s24  ;;  %p1120_p7 = scmp.lt.s32.totalorder %s1114_s24, %s1114_s24 }
  0x2e   :  { %p1121_p8 = por %p1120_p7, %p1119_p6 }
  0x30   :  { %p1122_p9 = pnand %p1121_p8, %p1115_p5 }
  0x32   :  { %1125 = shalt.err (!%p1122_p9)
}
  0x33   :  { %49 = dma.hbm_to_vmem [thread:$0]  %s1614_s2, 8192, %s44_s15, [#allocation6], %s1180_s27, %s1180_s27, %s1181_s28  }
  0x34   :  { %1170 = dma.done.wait [#allocation3], 8192  }
  0x35   :  { %1171 = vsyncadd [#allocation3], 4294959104 }
  0x36   :  { %1172 = dma.done.wait [#allocation6], 16384  }
  0x37   :  { %1173 = vsyncadd [#allocation6], 4294950912  ;;  %v59_v0 = vld [vmem:[#allocation2] sm:$0xff]  ;;  %v60_v2 = vld [vmem:[#allocation2 + $0x8] sm:$0xff]  ;;  %s1183_s2 = smov [#allocation8]  }
  0x38   :  { %v123_v1 = vld [vmem:[#allocation5] sm:$0xff]  ;;  %v124_v4 = vld [vmem:[#allocation5 + $0x8] sm:$0xff]  ;;  %v61_v5 = vld [vmem:[#allocation2 + $0x10] sm:$0xff]  ;;  %s1388_s25 = sshll.u32 %s1183_s2, 4  ;;  %s1412_s25 = int_to_ptr.vmem [resolvable:$true] %s1388_s25 }
  0x39   :  { %v187_v3 = vsub.f32 %v59_v0, %v123_v1  ;;  %v125_v6 = vld [vmem:[#allocation5 + $0x10] sm:$0xff]  ;;  %v188_v7 = vsub.f32 %v60_v2, %v124_v4  ;;  %v62_v9 = vld [vmem:[#allocation2 + $0x18] sm:$0xff]  ;;  %v63_v11 = vld [vmem:[#allocation2 + $0x20] sm:$0xff]  ;;  %s1126_s26 = scalar_lea.vmem %s1412_s25, 8192  ;;  %p1131_p11 = scmp.lt.s32.totalorder %s1412_s25, %s1412_s25 }
  0x3a   :  { %v189_v8 = vsub.f32 %v61_v5, %v125_v6  ;;  %v126_v10 = vld [vmem:[#allocation5 + $0x18] sm:$0xff]  ;;  %v127_v14 = vld [vmem:[#allocation5 + $0x20] sm:$0xff]  ;;  %v64_v15 = vld [vmem:[#allocation2 + $0x28] sm:$0xff]  ;;  %p1127_p10 = scmp.ne.s32.totalorder %s1412_s25, %s1126_s26  ;;  %p1132_p12 = scmp.lt.s32.totalorder %s1126_s26, %s1126_s26 }
  0x3b   :  { %v251_v12 = vmul.f32 %v187_v3, %v187_v3  ;;  %v190_v13 = vsub.f32 %v62_v9, %v126_v10  ;;  %v128_v16 = vld [vmem:[#allocation5 + $0x28] sm:$0xff]  ;;  %v252_v17 = vmul.f32 %v188_v7, %v188_v7  ;;  %v191_v19 = vsub.f32 %v63_v11, %v127_v14  ;;  %v65_v21 = vld [vmem:[#allocation2 + $0x30] sm:$0xff]  ;;  %v66_v23 = vld [vmem:[#allocation2 + $0x38] sm:$0xff] }
  0x3c   :  { %v253_v18 = vmul.f32 %v189_v8, %v189_v8  ;;  %v192_v20 = vsub.f32 %v64_v15, %v128_v16  ;;  %v129_v22 = vld [vmem:[#allocation5 + $0x30] sm:$0xff]  ;;  %v130_v26 = vld [vmem:[#allocation5 + $0x38] sm:$0xff]  ;;  %v67_v27 = vld [vmem:[#allocation2 + $0x40] sm:$0xff]  ;;  %p1133_p13 = por %p1132_p12, %p1131_p11 }
  0x3d   :  { %315 = vst [vmem:[#allocation8] sm:$0xff] %v251_v12  ;;  %v254_v24 = vmul.f32 %v190_v13, %v190_v13  ;;  %v193_v25 = vsub.f32 %v65_v21, %v129_v22  ;;  %v131_v28 = vld [vmem:[#allocation5 + $0x40] sm:$0xff]  ;;  %316 = vst [vmem:[#allocation8 + $0x8] sm:$0xff] %v252_v17  ;;  %v255_v29 = vmul.f32 %v191_v19, %v191_v19  ;;  %v68_v33 = vld [vmem:[#allocation2 + $0x48] sm:$0xff] }
  0x3e   :  { %317 = vst [vmem:[#allocation8 + $0x10] sm:$0xff] %v253_v18  ;;  %v256_v30 = vmul.f32 %v192_v20, %v192_v20  ;;  %v194_v31 = vsub.f32 %v66_v23, %v130_v26  ;;  %v195_v32 = vsub.f32 %v67_v27, %v131_v28  ;;  %v132_v34 = vld [vmem:[#allocation5 + $0x48] sm:$0xff]  ;;  %v69_v35 = vld [vmem:[#allocation2 + $0x50] sm:$0xff]  ;;  %v70_v39 = vld [vmem:[#allocation2 + $0x58] sm:$0xff]  ;;  %p1134_p0 = pnand %p1133_p13, %p1127_p10 }
  0x3f   :  { %318 = vst [vmem:[#allocation8 + $0x18] sm:$0xff] %v254_v24  ;;  %v257_v36 = vmul.f32 %v193_v25, %v193_v25  ;;  %v196_v37 = vsub.f32 %v68_v33, %v132_v34  ;;  %v133_v38 = vld [vmem:[#allocation5 + $0x50] sm:$0xff]  ;;  %v134_v40 = vld [vmem:[#allocation5 + $0x58] sm:$0xff]  ;;  %319 = vst [vmem:[#allocation8 + $0x20] sm:$0xff] %v255_v29 }
  0x40   :  { %320 = vst [vmem:[#allocation8 + $0x28] sm:$0xff] %v256_v30  ;;  %v258_v41 = vmul.f32 %v194_v31, %v194_v31  ;;  %v259_v42 = vmul.f32 %v195_v32, %v195_v32  ;;  %v197_v43 = vsub.f32 %v69_v35, %v133_v38  ;;  %v198_v44 = vsub.f32 %v70_v39, %v134_v40  ;;  %v71_v45 = vld [vmem:[#allocation2 + $0x60] sm:$0xff]  ;;  %v72_v47 = vld [vmem:[#allocation2 + $0x68] sm:$0xff]  ;;  %v73_v51 = vld [vmem:[#allocation2 + $0x70] sm:$0xff] }
  0x41   :  { %v135_v46 = vld [vmem:[#allocation5 + $0x60] sm:$0xff]  ;;  %321 = vst [vmem:[#allocation8 + $0x30] sm:$0xff] %v257_v36  ;;  %v260_v48 = vmul.f32 %v196_v37, %v196_v37  ;;  %v136_v50 = vld [vmem:[#allocation5 + $0x68] sm:$0xff]  ;;  %v137_v52 = vld [vmem:[#allocation5 + $0x70] sm:$0xff] }
  0x42   :  { %v199_v49 = vsub.f32 %v71_v45, %v135_v46  ;;  %322 = vst [vmem:[#allocation8 + $0x38] sm:$0xff] %v258_v41  ;;  %323 = vst [vmem:[#allocation8 + $0x40] sm:$0xff] %v259_v42  ;;  %v261_v53 = vmul.f32 %v197_v43, %v197_v43  ;;  %v262_v54 = vmul.f32 %v198_v44, %v198_v44  ;;  %v74_v57 = vld [vmem:[#allocation2 + $0x78] sm:$0xff]  ;;  %v75_v59 = vld [vmem:[#allocation2 + $0x80] sm:$0xff] }
  0x43   :  { %v200_v55 = vsub.f32 %v72_v47, %v136_v50  ;;  %v201_v56 = vsub.f32 %v73_v51, %v137_v52  ;;  %v138_v58 = vld [vmem:[#allocation5 + $0x78] sm:$0xff]  ;;  %324 = vst [vmem:[#allocation8 + $0x48] sm:$0xff] %v260_v48  ;;  %v139_v62 = vld [vmem:[#allocation5 + $0x80] sm:$0xff]  ;;  %v76_v63 = vld [vmem:[#allocation2 + $0x88] sm:$0xff] }
  0x44   :  { %v263_v60 = vmul.f32 %v199_v49, %v199_v49  ;;  %v202_v61 = vsub.f32 %v74_v57, %v138_v58  ;;  %v140_v0 = vld [vmem:[#allocation5 + $0x88] sm:$0xff]  ;;  %325 = vst [vmem:[#allocation8 + $0x50] sm:$0xff] %v261_v53  ;;  %326 = vst [vmem:[#allocation8 + $0x58] sm:$0xff] %v262_v54  ;;  %v203_v3 = vsub.f32 %v75_v59, %v139_v62  ;;  %v77_v5 = vld [vmem:[#allocation2 + $0x90] sm:$0xff] }
  0x45   :  { %v264_v1 = vmul.f32 %v200_v55, %v200_v55  ;;  %v265_v2 = vmul.f32 %v201_v56, %v201_v56  ;;  %v204_v4 = vsub.f32 %v76_v63, %v140_v0  ;;  %v141_v6 = vld [vmem:[#allocation5 + $0x90] sm:$0xff]  ;;  %v78_v7 = vld [vmem:[#allocation2 + $0x98] sm:$0xff]  ;;  %v79_v11 = vld [vmem:[#allocation2 + $0xa0] sm:$0xff] }
  0x46   :  { %327 = vst [vmem:[#allocation8 + $0x60] sm:$0xff] %v263_v60  ;;  %v266_v8 = vmul.f32 %v202_v61, %v202_v61  ;;  %v205_v9 = vsub.f32 %v77_v5, %v141_v6  ;;  %v142_v10 = vld [vmem:[#allocation5 + $0x98] sm:$0xff]  ;;  %v143_v12 = vld [vmem:[#allocation5 + $0xa0] sm:$0xff]  ;;  %v267_v13 = vmul.f32 %v203_v3, %v203_v3  ;;  %v80_v17 = vld [vmem:[#allocation2 + $0xa8] sm:$0xff] }
  0x47   :  { %328 = vst [vmem:[#allocation8 + $0x68] sm:$0xff] %v264_v1  ;;  %329 = vst [vmem:[#allocation8 + $0x70] sm:$0xff] %v265_v2  ;;  %v268_v14 = vmul.f32 %v204_v4, %v204_v4  ;;  %v206_v15 = vsub.f32 %v78_v7, %v142_v10  ;;  %v207_v16 = vsub.f32 %v79_v11, %v143_v12  ;;  %v144_v18 = vld [vmem:[#allocation5 + $0xa8] sm:$0xff]  ;;  %v81_v19 = vld [vmem:[#allocation2 + $0xb0] sm:$0xff] }
  0x48   :  { %330 = vst [vmem:[#allocation8 + $0x78] sm:$0xff] %v266_v8  ;;  %v269_v20 = vmul.f32 %v205_v9, %v205_v9  ;;  %v208_v21 = vsub.f32 %v80_v17, %v144_v18  ;;  %v145_v22 = vld [vmem:[#allocation5 + $0xb0] sm:$0xff]  ;;  %v82_v23 = vld [vmem:[#allocation2 + $0xb8] sm:$0xff]  ;;  %331 = vst [vmem:[#allocation8 + $0x80] sm:$0xff] %v267_v13 }
  0x49   :  { %v146_v24 = vld [vmem:[#allocation5 + $0xb8] sm:$0xff]  ;;  %332 = vst [vmem:[#allocation8 + $0x88] sm:$0xff] %v268_v14  ;;  %v270_v25 = vmul.f32 %v206_v15, %v206_v15  ;;  %v271_v26 = vmul.f32 %v207_v16, %v207_v16  ;;  %v209_v27 = vsub.f32 %v81_v19, %v145_v22  ;;  %v83_v29 = vld [vmem:[#allocation2 + $0xc0] sm:$0xff]  ;;  %v84_v31 = vld [vmem:[#allocation2 + $0xc8] sm:$0xff] }
  0x4a   :  { %v210_v28 = vsub.f32 %v82_v23, %v146_v24  ;;  %v147_v30 = vld [vmem:[#allocation5 + $0xc0] sm:$0xff]  ;;  %333 = vst [vmem:[#allocation8 + $0x90] sm:$0xff] %v269_v20  ;;  %v272_v32 = vmul.f32 %v208_v21, %v208_v21  ;;  %v148_v34 = vld [vmem:[#allocation5 + $0xc8] sm:$0xff]  ;;  %v85_v35 = vld [vmem:[#allocation2 + $0xd0] sm:$0xff] }
  0x4b   :  { %v211_v33 = vsub.f32 %v83_v29, %v147_v30  ;;  %v149_v36 = vld [vmem:[#allocation5 + $0xd0] sm:$0xff]  ;;  %334 = vst [vmem:[#allocation8 + $0x98] sm:$0xff] %v270_v25  ;;  %335 = vst [vmem:[#allocation8 + $0xa0] sm:$0xff] %v271_v26  ;;  %v273_v37 = vmul.f32 %v209_v27, %v209_v27  ;;  %v212_v39 = vsub.f32 %v84_v31, %v148_v34  ;;  %v86_v41 = vld [vmem:[#allocation2 + $0xd8] sm:$0xff] }
  0x4c   :  { %v274_v38 = vmul.f32 %v210_v28, %v210_v28  ;;  %v213_v40 = vsub.f32 %v85_v35, %v149_v36  ;;  %v150_v42 = vld [vmem:[#allocation5 + $0xd8] sm:$0xff]  ;;  %v87_v43 = vld [vmem:[#allocation2 + $0xe0] sm:$0xff]  ;;  %336 = vst [vmem:[#allocation8 + $0xa8] sm:$0xff] %v272_v32  ;;  %v88_v47 = vld [vmem:[#allocation2 + $0xe8] sm:$0xff] }
  0x4d   :  { %v275_v44 = vmul.f32 %v211_v33, %v211_v33  ;;  %v214_v45 = vsub.f32 %v86_v41, %v150_v42  ;;  %v151_v46 = vld [vmem:[#allocation5 + $0xe0] sm:$0xff]  ;;  %v152_v48 = vld [vmem:[#allocation5 + $0xe8] sm:$0xff]  ;;  %337 = vst [vmem:[#allocation8 + $0xb0] sm:$0xff] %v273_v37  ;;  %v276_v49 = vmul.f32 %v212_v39, %v212_v39  ;;  %v89_v53 = vld [vmem:[#allocation2 + $0xf0] sm:$0xff] }
  0x4e   :  { %338 = vst [vmem:[#allocation8 + $0xb8] sm:$0xff] %v274_v38  ;;  %v277_v50 = vmul.f32 %v213_v40, %v213_v40  ;;  %v215_v51 = vsub.f32 %v87_v43, %v151_v46  ;;  %v216_v52 = vsub.f32 %v88_v47, %v152_v48  ;;  %v153_v54 = vld [vmem:[#allocation5 + $0xf0] sm:$0xff]  ;;  %v90_v55 = vld [vmem:[#allocation2 + $0xf8] sm:$0xff]  ;;  %v91_v59 = vld [vmem:[#allocation2 + $0x100] sm:$0xff] }
  0x4f   :  { %339 = vst [vmem:[#allocation8 + $0xc0] sm:$0xff] %v275_v44  ;;  %v278_v56 = vmul.f32 %v214_v45, %v214_v45  ;;  %v217_v57 = vsub.f32 %v89_v53, %v153_v54  ;;  %v154_v58 = vld [vmem:[#allocation5 + $0xf8] sm:$0xff]  ;;  %v155_v60 = vld [vmem:[#allocation5 + $0x100] sm:$0xff]  ;;  %340 = vst [vmem:[#allocation8 + $0xc8] sm:$0xff] %v276_v49 }
  0x50   :  { %341 = vst [vmem:[#allocation8 + $0xd0] sm:$0xff] %v277_v50  ;;  %v279_v61 = vmul.f32 %v215_v51, %v215_v51  ;;  %v280_v62 = vmul.f32 %v216_v52, %v216_v52  ;;  %v218_v63 = vsub.f32 %v90_v55, %v154_v58  ;;  %v219_v0 = vsub.f32 %v91_v59, %v155_v60  ;;  %v92_v1 = vld [vmem:[#allocation2 + $0x108] sm:$0xff]  ;;  %v93_v3 = vld [vmem:[#allocation2 + $0x110] sm:$0xff]  ;;  %v94_v7 = vld [vmem:[#allocation2 + $0x118] sm:$0xff] }
  0x51   :  { %v156_v2 = vld [vmem:[#allocation5 + $0x108] sm:$0xff]  ;;  %342 = vst [vmem:[#allocation8 + $0xd8] sm:$0xff] %v278_v56  ;;  %v281_v4 = vmul.f32 %v217_v57, %v217_v57  ;;  %v157_v6 = vld [vmem:[#allocation5 + $0x110] sm:$0xff]  ;;  %v158_v8 = vld [vmem:[#allocation5 + $0x118] sm:$0xff] }
  0x52   :  { %v220_v5 = vsub.f32 %v92_v1, %v156_v2  ;;  %343 = vst [vmem:[#allocation8 + $0xe0] sm:$0xff] %v279_v61  ;;  %344 = vst [vmem:[#allocation8 + $0xe8] sm:$0xff] %v280_v62  ;;  %v282_v9 = vmul.f32 %v218_v63, %v218_v63  ;;  %v283_v10 = vmul.f32 %v219_v0, %v219_v0  ;;  %v95_v13 = vld [vmem:[#allocation2 + $0x120] sm:$0xff]  ;;  %v96_v15 = vld [vmem:[#allocation2 + $0x128] sm:$0xff] }
  0x53   :  { %v221_v11 = vsub.f32 %v93_v3, %v157_v6  ;;  %v222_v12 = vsub.f32 %v94_v7, %v158_v8  ;;  %v159_v14 = vld [vmem:[#allocation5 + $0x120] sm:$0xff]  ;;  %345 = vst [vmem:[#allocation8 + $0xf0] sm:$0xff] %v281_v4  ;;  %v160_v18 = vld [vmem:[#allocation5 + $0x128] sm:$0xff]  ;;  %v97_v19 = vld [vmem:[#allocation2 + $0x130] sm:$0xff] }
  0x54   :  { %v284_v16 = vmul.f32 %v220_v5, %v220_v5  ;;  %v223_v17 = vsub.f32 %v95_v13, %v159_v14  ;;  %v161_v20 = vld [vmem:[#allocation5 + $0x130] sm:$0xff]  ;;  %346 = vst [vmem:[#allocation8 + $0xf8] sm:$0xff] %v282_v9  ;;  %347 = vst [vmem:[#allocation8 + $0x100] sm:$0xff] %v283_v10  ;;  %v224_v23 = vsub.f32 %v96_v15, %v160_v18  ;;  %v98_v25 = vld [vmem:[#allocation2 + $0x138] sm:$0xff] }
  0x55   :  { %v285_v21 = vmul.f32 %v221_v11, %v221_v11  ;;  %v286_v22 = vmul.f32 %v222_v12, %v222_v12  ;;  %v225_v24 = vsub.f32 %v97_v19, %v161_v20  ;;  %v162_v26 = vld [vmem:[#allocation5 + $0x138] sm:$0xff]  ;;  %v99_v27 = vld [vmem:[#allocation2 + $0x140] sm:$0xff]  ;;  %v100_v31 = vld [vmem:[#allocation2 + $0x148] sm:$0xff] }
  0x56   :  { %348 = vst [vmem:[#allocation8 + $0x108] sm:$0xff] %v284_v16  ;;  %v287_v28 = vmul.f32 %v223_v17, %v223_v17  ;;  %v226_v29 = vsub.f32 %v98_v25, %v162_v26  ;;  %v163_v30 = vld [vmem:[#allocation5 + $0x140] sm:$0xff]  ;;  %v164_v32 = vld [vmem:[#allocation5 + $0x148] sm:$0xff]  ;;  %v288_v33 = vmul.f32 %v224_v23, %v224_v23  ;;  %v101_v37 = vld [vmem:[#allocation2 + $0x150] sm:$0xff] }
  0x57   :  { %349 = vst [vmem:[#allocation8 + $0x110] sm:$0xff] %v285_v21  ;;  %350 = vst [vmem:[#allocation8 + $0x118] sm:$0xff] %v286_v22  ;;  %v289_v34 = vmul.f32 %v225_v24, %v225_v24  ;;  %v227_v35 = vsub.f32 %v99_v27, %v163_v30  ;;  %v228_v36 = vsub.f32 %v100_v31, %v164_v32  ;;  %v165_v38 = vld [vmem:[#allocation5 + $0x150] sm:$0xff]  ;;  %v102_v39 = vld [vmem:[#allocation2 + $0x158] sm:$0xff] }
  0x58   :  { %351 = vst [vmem:[#allocation8 + $0x120] sm:$0xff] %v287_v28  ;;  %v290_v40 = vmul.f32 %v226_v29, %v226_v29  ;;  %v229_v41 = vsub.f32 %v101_v37, %v165_v38  ;;  %v166_v42 = vld [vmem:[#allocation5 + $0x158] sm:$0xff]  ;;  %v103_v43 = vld [vmem:[#allocation2 + $0x160] sm:$0xff]  ;;  %352 = vst [vmem:[#allocation8 + $0x128] sm:$0xff] %v288_v33 }
  0x59   :  { %v167_v44 = vld [vmem:[#allocation5 + $0x160] sm:$0xff]  ;;  %353 = vst [vmem:[#allocation8 + $0x130] sm:$0xff] %v289_v34  ;;  %v291_v45 = vmul.f32 %v227_v35, %v227_v35  ;;  %v292_v46 = vmul.f32 %v228_v36, %v228_v36  ;;  %v230_v47 = vsub.f32 %v102_v39, %v166_v42  ;;  %v104_v49 = vld [vmem:[#allocation2 + $0x168] sm:$0xff]  ;;  %v105_v51 = vld [vmem:[#allocation2 + $0x170] sm:$0xff] }
  0x5a   :  { %v231_v48 = vsub.f32 %v103_v43, %v167_v44  ;;  %v168_v50 = vld [vmem:[#allocation5 + $0x168] sm:$0xff]  ;;  %354 = vst [vmem:[#allocation8 + $0x138] sm:$0xff] %v290_v40  ;;  %v293_v52 = vmul.f32 %v229_v41, %v229_v41  ;;  %v169_v54 = vld [vmem:[#allocation5 + $0x170] sm:$0xff]  ;;  %v106_v55 = vld [vmem:[#allocation2 + $0x178] sm:$0xff] }
  0x5b   :  { %v232_v53 = vsub.f32 %v104_v49, %v168_v50  ;;  %v170_v56 = vld [vmem:[#allocation5 + $0x178] sm:$0xff]  ;;  %355 = vst [vmem:[#allocation8 + $0x140] sm:$0xff] %v291_v45  ;;  %356 = vst [vmem:[#allocation8 + $0x148] sm:$0xff] %v292_v46  ;;  %v294_v57 = vmul.f32 %v230_v47, %v230_v47  ;;  %v233_v59 = vsub.f32 %v105_v51, %v169_v54  ;;  %v107_v61 = vld [vmem:[#allocation2 + $0x180] sm:$0xff] }
  0x5c   :  { %v295_v58 = vmul.f32 %v231_v48, %v231_v48  ;;  %v234_v60 = vsub.f32 %v106_v55, %v170_v56  ;;  %v171_v62 = vld [vmem:[#allocation5 + $0x180] sm:$0xff]  ;;  %v108_v63 = vld [vmem:[#allocation2 + $0x188] sm:$0xff]  ;;  %357 = vst [vmem:[#allocation8 + $0x150] sm:$0xff] %v293_v52  ;;  %v109_v3 = vld [vmem:[#allocation2 + $0x190] sm:$0xff] }
  0x5d   :  { %v296_v0 = vmul.f32 %v232_v53, %v232_v53  ;;  %v235_v1 = vsub.f32 %v107_v61, %v171_v62  ;;  %v172_v2 = vld [vmem:[#allocation5 + $0x188] sm:$0xff]  ;;  %v173_v4 = vld [vmem:[#allocation5 + $0x190] sm:$0xff]  ;;  %358 = vst [vmem:[#allocation8 + $0x158] sm:$0xff] %v294_v57  ;;  %v297_v5 = vmul.f32 %v233_v59, %v233_v59  ;;  %v110_v9 = vld [vmem:[#allocation2 + $0x198] sm:$0xff] }
  0x5e   :  { %359 = vst [vmem:[#allocation8 + $0x160] sm:$0xff] %v295_v58  ;;  %v298_v6 = vmul.f32 %v234_v60, %v234_v60  ;;  %v236_v7 = vsub.f32 %v108_v63, %v172_v2  ;;  %v237_v8 = vsub.f32 %v109_v3, %v173_v4  ;;  %v174_v10 = vld [vmem:[#allocation5 + $0x198] sm:$0xff]  ;;  %v111_v11 = vld [vmem:[#allocation2 + $0x1a0] sm:$0xff]  ;;  %v112_v15 = vld [vmem:[#allocation2 + $0x1a8] sm:$0xff] }
  0x5f   :  { %360 = vst [vmem:[#allocation8 + $0x168] sm:$0xff] %v296_v0  ;;  %v299_v12 = vmul.f32 %v235_v1, %v235_v1  ;;  %v238_v13 = vsub.f32 %v110_v9, %v174_v10  ;;  %v175_v14 = vld [vmem:[#allocation5 + $0x1a0] sm:$0xff]  ;;  %v176_v16 = vld [vmem:[#allocation5 + $0x1a8] sm:$0xff]  ;;  %361 = vst [vmem:[#allocation8 + $0x170] sm:$0xff] %v297_v5 }
  0x60   :  { %362 = vst [vmem:[#allocation8 + $0x178] sm:$0xff] %v298_v6  ;;  %v300_v17 = vmul.f32 %v236_v7, %v236_v7  ;;  %v301_v18 = vmul.f32 %v237_v8, %v237_v8  ;;  %v239_v19 = vsub.f32 %v111_v11, %v175_v14  ;;  %v240_v20 = vsub.f32 %v112_v15, %v176_v16  ;;  %v113_v21 = vld [vmem:[#allocation2 + $0x1b0] sm:$0xff]  ;;  %v114_v23 = vld [vmem:[#allocation2 + $0x1b8] sm:$0xff]  ;;  %v115_v27 = vld [vmem:[#allocation2 + $0x1c0] sm:$0xff] }
  0x61   :  { %v177_v22 = vld [vmem:[#allocation5 + $0x1b0] sm:$0xff]  ;;  %363 = vst [vmem:[#allocation8 + $0x180] sm:$0xff] %v299_v12  ;;  %v302_v24 = vmul.f32 %v238_v13, %v238_v13  ;;  %v178_v26 = vld [vmem:[#allocation5 + $0x1b8] sm:$0xff]  ;;  %v179_v28 = vld [vmem:[#allocation5 + $0x1c0] sm:$0xff] }
  0x62   :  { %v241_v25 = vsub.f32 %v113_v21, %v177_v22  ;;  %364 = vst [vmem:[#allocation8 + $0x188] sm:$0xff] %v300_v17  ;;  %365 = vst [vmem:[#allocation8 + $0x190] sm:$0xff] %v301_v18  ;;  %v303_v29 = vmul.f32 %v239_v19, %v239_v19  ;;  %v304_v30 = vmul.f32 %v240_v20, %v240_v20  ;;  %v116_v33 = vld [vmem:[#allocation2 + $0x1c8] sm:$0xff]  ;;  %v117_v35 = vld [vmem:[#allocation2 + $0x1d0] sm:$0xff] }
  0x63   :  { %v242_v31 = vsub.f32 %v114_v23, %v178_v26  ;;  %v243_v32 = vsub.f32 %v115_v27, %v179_v28  ;;  %v180_v34 = vld [vmem:[#allocation5 + $0x1c8] sm:$0xff]  ;;  %366 = vst [vmem:[#allocation8 + $0x198] sm:$0xff] %v302_v24  ;;  %v181_v38 = vld [vmem:[#allocation5 + $0x1d0] sm:$0xff]  ;;  %v118_v39 = vld [vmem:[#allocation2 + $0x1d8] sm:$0xff] }
  0x64   :  { %v305_v36 = vmul.f32 %v241_v25, %v241_v25  ;;  %v244_v37 = vsub.f32 %v116_v33, %v180_v34  ;;  %v182_v40 = vld [vmem:[#allocation5 + $0x1d8] sm:$0xff]  ;;  %367 = vst [vmem:[#allocation8 + $0x1a0] sm:$0xff] %v303_v29  ;;  %368 = vst [vmem:[#allocation8 + $0x1a8] sm:$0xff] %v304_v30  ;;  %v245_v43 = vsub.f32 %v117_v35, %v181_v38  ;;  %v119_v45 = vld [vmem:[#allocation2 + $0x1e0] sm:$0xff] }
  0x65   :  { %v306_v41 = vmul.f32 %v242_v31, %v242_v31  ;;  %v307_v42 = vmul.f32 %v243_v32, %v243_v32  ;;  %v246_v44 = vsub.f32 %v118_v39, %v182_v40  ;;  %v183_v46 = vld [vmem:[#allocation5 + $0x1e0] sm:$0xff]  ;;  %v120_v47 = vld [vmem:[#allocation2 + $0x1e8] sm:$0xff]  ;;  %v121_v51 = vld [vmem:[#allocation2 + $0x1f0] sm:$0xff] }
  0x66   :  { %369 = vst [vmem:[#allocation8 + $0x1b0] sm:$0xff] %v305_v36  ;;  %v308_v48 = vmul.f32 %v244_v37, %v244_v37  ;;  %v247_v49 = vsub.f32 %v119_v45, %v183_v46  ;;  %v184_v50 = vld [vmem:[#allocation5 + $0x1e8] sm:$0xff]  ;;  %v185_v52 = vld [vmem:[#allocation5 + $0x1f0] sm:$0xff]  ;;  %v309_v53 = vmul.f32 %v245_v43, %v245_v43  ;;  %v122_v57 = vld [vmem:[#allocation2 + $0x1f8] sm:$0xff] }
  0x67   :  { %370 = vst [vmem:[#allocation8 + $0x1b8] sm:$0xff] %v306_v41  ;;  %371 = vst [vmem:[#allocation8 + $0x1c0] sm:$0xff] %v307_v42  ;;  %v310_v54 = vmul.f32 %v246_v44, %v246_v44  ;;  %v248_v55 = vsub.f32 %v120_v47, %v184_v50  ;;  %v249_v56 = vsub.f32 %v121_v51, %v185_v52  ;;  %v186_v58 = vld [vmem:[#allocation5 + $0x1f8] sm:$0xff]  ;;  %v379_v59 = vld [vmem:[#allocation7] sm:$0xff] }
  0x68   :  { %372 = vst [vmem:[#allocation8 + $0x1c8] sm:$0xff] %v308_v48  ;;  %v311_v60 = vmul.f32 %v247_v49, %v247_v49  ;;  %v250_v61 = vsub.f32 %v122_v57, %v186_v58  ;;  %v1262_v62 = vadd.f32 1e-10, %v379_v59  ;;  %v380_v63 = vld [vmem:[#allocation7 + $0x8] sm:$0xff]  ;;  %v381_v0 = vld [vmem:[#allocation7 + $0x10] sm:$0xff]  ;;  %v382_v1 = vld [vmem:[#allocation7 + $0x18] sm:$0xff] }
  0x69   :  { %373 = vst [vmem:[#allocation8 + $0x1d0] sm:$0xff] %v309_v53  ;;  %374 = vst [vmem:[#allocation8 + $0x1d8] sm:$0xff] %v310_v54  ;;  %v312_v2 = vmul.f32 %v248_v55, %v248_v55  ;;  %v313_v3 = vmul.f32 %v249_v56, %v249_v56  ;;  %v1264_v4 = vadd.f32 1e-10, %v380_v63  ;;  %v1266_v5 = vadd.f32 1e-10, %v381_v0 }
  0x6a   :  { %v383_v6 = vld [vmem:[#allocation7 + $0x20] sm:$0xff]  ;;  %v384_v7 = vld [vmem:[#allocation7 + $0x28] sm:$0xff]  ;;  %375 = vst [vmem:[#allocation8 + $0x1e0] sm:$0xff] %v311_v60  ;;  %v314_v8 = vmul.f32 %v250_v61, %v250_v61  ;;  %932 = vlog2.f32 %v1262_v62  ;;  %v1269_v9 = vadd.f32 1e-10, %v382_v1  ;;  %v385_v10 = vld [vmem:[#allocation7 + $0x30] sm:$0xff] }
  0x6b   :  { %v386_v11 = vld [vmem:[#allocation7 + $0x38] sm:$0xff]  ;;  %376 = vst [vmem:[#allocation8 + $0x1e8] sm:$0xff] %v312_v2  ;;  %377 = vst [vmem:[#allocation8 + $0x1f0] sm:$0xff] %v313_v3  ;;  %934 = vlog2.f32 %v1264_v4  ;;  %v1272_v12 = vadd.f32 1e-10, %v383_v6  ;;  %v387_v13 = vld [vmem:[#allocation7 + $0x40] sm:$0xff] }
  0x6c   :  { %378 = vst [vmem:[#allocation8 + $0x1f8] sm:$0xff] %v314_v8  ;;  %v507_v14 = vsub.f32 0.0, %v1262_v62  ;;  %936 = vlog2.f32 %v1266_v5  ;;  %v1276_v15 = vadd.f32 1e-10, %v384_v7  ;;  %v1278_v16 = vadd.f32 1e-10, %v385_v10 }
  0x6d   :  { %v388_v17 = vld [vmem:[#allocation7 + $0x48] sm:$0xff]  ;;  %v508_v18 = vsub.f32 0.0, %v1264_v4  ;;  %v509_v19 = vsub.f32 0.0, %v1266_v5  ;;  %938 = vlog2.f32 %v1269_v9  ;;  %v1283_v20 = vadd.f32 1e-10, %v386_v11  ;;  %v389_v21 = vld [vmem:[#allocation7 + $0x50] sm:$0xff] }
  0x6e   :  { %v510_v22 = vsub.f32 0.0, %v1269_v9  ;;  %v511_v23 = vsub.f32 0.0, %v1272_v12  ;;  %940 = vlog2.f32 %v1272_v12  ;;  %v1288_v24 = vadd.f32 1e-10, %v387_v13  ;;  %v390_v25 = vld [vmem:[#allocation7 + $0x58] sm:$0xff]  ;;  %v391_v26 = vld [vmem:[#allocation7 + $0x60] sm:$0xff] }
  0x6f   :  { %v512_v27 = vsub.f32 0.0, %v1276_v15  ;;  %942 = vlog2.f32 %v1276_v15  ;;  %v513_v28 = vsub.f32 0.0, %v1278_v16  ;;  %v1293_v29 = vadd.f32 1e-10, %v388_v17  ;;  %v392_v30 = vld [vmem:[#allocation7 + $0x68] sm:$0xff]  ;;  %v393_v31 = vld [vmem:[#allocation7 + $0x70] sm:$0xff] }
  0x70   :  { %944 = vlog2.f32 %v1278_v16  ;;  %v514_v32 = vsub.f32 0.0, %v1283_v20  ;;  %v515_v33 = vsub.f32 0.0, %v1288_v24  ;;  %v1298_v34 = vadd.f32 1e-10, %v389_v21  ;;  %v394_v35 = vld [vmem:[#allocation7 + $0x78] sm:$0xff]  ;;  %v395_v39 = vld [vmem:[#allocation7 + $0x80] sm:$0xff] }
  0x71   :  { %946 = vlog2.f32 %v1283_v20  ;;  %v516_v36 = vsub.f32 0.0, %v1293_v29  ;;  %v1302_v37 = vadd.f32 1e-10, %v390_v25  ;;  %v1304_v38 = vadd.f32 1e-10, %v391_v26  ;;  %v396_v43 = vld [vmem:[#allocation7 + $0x88] sm:$0xff] }
  0x72   :  { %948 = vlog2.f32 %v1288_v24  ;;  %v517_v40 = vsub.f32 0.0, %v1298_v34  ;;  %v1308_v41 = vadd.f32 1e-10, %v392_v30  ;;  %v1310_v42 = vadd.f32 1e-10, %v393_v31  ;;  %v397_v47 = vld [vmem:[#allocation7 + $0x90] sm:$0xff] }
  0x73   :  { %950 = vlog2.f32 %v1293_v29  ;;  %v518_v44 = vsub.f32 0.0, %v1302_v37  ;;  %v519_v45 = vsub.f32 0.0, %v1304_v38  ;;  %v1315_v46 = vadd.f32 1e-10, %v394_v35  ;;  %v398_v52 = vld [vmem:[#allocation7 + $0x98] sm:$0xff]  ;;  %v399_v57 = vld [vmem:[#allocation7 + $0xa0] sm:$0xff] }
  0x74   :  { %v933_v48 = vpop.eup %932  ;;  %952 = vlog2.f32 %v1298_v34  ;;  %v520_v49 = vsub.f32 0.0, %v1308_v41  ;;  %v521_v50 = vsub.f32 0.0, %v1310_v42  ;;  %v1320_v51 = vadd.f32 1e-10, %v395_v39 }
  0x75   :  { %v935_v53 = vpop.eup %934  ;;  %v572_v54 = vmul.f32 0.6931472, %v933_v48  ;;  %954 = vlog2.f32 %v1302_v37  ;;  %v522_v55 = vsub.f32 0.0, %v1315_v46  ;;  %v1324_v56 = vadd.f32 1e-10, %v396_v43 }
  0x76   :  { %v937_v58 = vpop.eup %936  ;;  %v574_v59 = vmul.f32 0.6931472, %v935_v53  ;;  %956 = vlog2.f32 %v1304_v38  ;;  %v523_v60 = vsub.f32 0.0, %v1320_v51  ;;  %v1328_v61 = vadd.f32 1e-10, %v397_v47 }
  0x77   :  { %v939_v62 = vpop.eup %938  ;;  %v699_v63 = vmul.f32 %v572_v54, %v507_v14  ;;  %v576_v0 = vmul.f32 0.6931472, %v937_v58  ;;  %958 = vlog2.f32 %v1308_v41  ;;  %v1331_v1 = vadd.f32 1e-10, %v398_v52  ;;  %v401_v52 = vld [vmem:[#allocation7 + $0xb0] sm:$0xff] }
  0x78   :  { %v941_v2 = vpop.eup %940  ;;  %v700_v3 = vmul.f32 %v574_v59, %v508_v18  ;;  %v578_v4 = vmul.f32 0.6931472, %v939_v62  ;;  %960 = vlog2.f32 %v1310_v42  ;;  %v1334_v6 = vadd.f32 1e-10, %v399_v57 }
  0x79   :  { %v943_v7 = vpop.eup %942  ;;  %v763_v8 = vmul.f32 0.001, %v699_v63  ;;  %v701_v10 = vmul.f32 %v576_v0, %v509_v19  ;;  %v580_v11 = vmul.f32 0.6931472, %v941_v2  ;;  %962 = vlog2.f32 %v1315_v46 }
  0x7a   :  { %v945_v13 = vpop.eup %944  ;;  %v764_v14 = vmul.f32 0.001, %v700_v3  ;;  %v702_v17 = vmul.f32 %v578_v4, %v510_v22  ;;  %v582_v21 = vmul.f32 0.6931472, %v943_v7  ;;  %964 = vlog2.f32 %v1320_v51  ;;  %v406_v51 = vld [vmem:[#allocation7 + $0xd8] sm:$0xff] }
  0x7b   :  { %v947_v18 = vpop.eup %946  ;;  %827 = vst [vmem:[#allocation9] sm:$0xff] %v763_v8  ;;  %v765_v25 = vmul.f32 0.001, %v701_v10  ;;  %v703_v26 = vmul.f32 %v580_v11, %v511_v23  ;;  %v584_v30 = vmul.f32 0.6931472, %v945_v13  ;;  %966 = vlog2.f32 %v1324_v56  ;;  %v400_v23 = vld [vmem:[#allocation7 + $0xa8] sm:$0xff] }
  0x7c   :  { %v949_v5 = vpop.eup %948  ;;  %828 = vst [vmem:[#allocation9 + $0x8] sm:$0xff] %v764_v14  ;;  %v766_v19 = vmul.f32 0.001, %v702_v17  ;;  %v704_v31 = vmul.f32 %v582_v21, %v512_v27  ;;  %v586_v9 = vmul.f32 0.6931472, %v947_v18  ;;  %968 = vlog2.f32 %v1328_v61 }
  0x7d   :  { %v951_v22 = vpop.eup %950  ;;  %829 = vst [vmem:[#allocation9 + $0x10] sm:$0xff] %v765_v25  ;;  %v767_v35 = vmul.f32 0.001, %v703_v26  ;;  %v705_v39 = vmul.f32 %v584_v30, %v513_v28  ;;  %v588_v12 = vmul.f32 0.6931472, %v949_v5  ;;  %970 = vlog2.f32 %v1331_v1 }
  0x7e   :  { %v953_v43 = vpop.eup %952  ;;  %830 = vst [vmem:[#allocation9 + $0x18] sm:$0xff] %v766_v19  ;;  %v768_v47 = vmul.f32 0.001, %v704_v31  ;;  %v706_v15 = vmul.f32 %v586_v9, %v514_v32  ;;  %v590_v27 = vmul.f32 0.6931472, %v951_v22  ;;  %v524_v48 = vsub.f32 0.0, %v1324_v56 }
  0x7f   :  { %v955_v53 = vpop.eup %954  ;;  %831 = vst [vmem:[#allocation9 + $0x20] sm:$0xff] %v767_v35  ;;  %v769_v54 = vmul.f32 0.001, %v705_v39  ;;  %v707_v16 = vmul.f32 %v588_v12, %v515_v33  ;;  %v592_v28 = vmul.f32 0.6931472, %v953_v43  ;;  %972 = vlog2.f32 %v1334_v6 }
  0x80   :  { %v957_v57 = vpop.eup %956  ;;  %832 = vst [vmem:[#allocation9 + $0x28] sm:$0xff] %v768_v47  ;;  %v770_v58 = vmul.f32 0.001, %v706_v15  ;;  %v708_v20 = vmul.f32 %v590_v27, %v516_v36  ;;  %v594_v32 = vmul.f32 0.6931472, %v955_v53  ;;  %v525_v36 = vsub.f32 0.0, %v1328_v61 }
  0x81   :  { %v1359_v59 = vadd.f32 1e-10, %v400_v23  ;;  %v959_v56 = vpop.eup %958  ;;  %833 = vst [vmem:[#allocation9 + $0x30] sm:$0xff] %v769_v54  ;;  %v771_v62 = vmul.f32 0.001, %v707_v16  ;;  %v709_v63 = vmul.f32 %v592_v28, %v517_v40  ;;  %v402_v40 = vld [vmem:[#allocation7 + $0xb8] sm:$0xff] }
  0x82   :  { %v596_v24 = vmul.f32 0.6931472, %v957_v57  ;;  %v1363_v33 = vadd.f32 1e-10, %v401_v52  ;;  %v961_v0 = vpop.eup %960  ;;  %834 = vst [vmem:[#allocation9 + $0x38] sm:$0xff] %v770_v58  ;;  %v710_v3 = vmul.f32 %v594_v32, %v518_v44  ;;  %v526_v13 = vsub.f32 0.0, %v1331_v1 }
  0x83   :  { %v772_v2 = vmul.f32 0.001, %v708_v20  ;;  %v598_v29 = vmul.f32 0.6931472, %v959_v56  ;;  %v963_v4 = vpop.eup %962  ;;  %835 = vst [vmem:[#allocation9 + $0x40] sm:$0xff] %v771_v62  ;;  %974 = vlog2.f32 %v1359_v59  ;;  %v403_v61 = vld [vmem:[#allocation7 + $0xc0] sm:$0xff] }
  0x84   :  { %v773_v7 = vmul.f32 0.001, %v709_v63  ;;  %v711_v8 = vmul.f32 %v596_v24, %v519_v45  ;;  %v600_v34 = vmul.f32 0.6931472, %v961_v0  ;;  %v965_v10 = vpop.eup %964  ;;  %v774_v11 = vmul.f32 0.001, %v710_v3 }
  0x85   :  { %836 = vst [vmem:[#allocation9 + $0x48] sm:$0xff] %v772_v2  ;;  %v712_v37 = vmul.f32 %v598_v29, %v520_v49  ;;  %v602_v44 = vmul.f32 0.6931472, %v963_v4  ;;  %v967_v14 = vpop.eup %966  ;;  %v604_v45 = vmul.f32 0.6931472, %v965_v10  ;;  %976 = vlog2.f32 %v1363_v33  ;;  %v404_v1 = vld [vmem:[#allocation7 + $0xc8] sm:$0xff] }
  0x86   :  { %837 = vst [vmem:[#allocation9 + $0x50] sm:$0xff] %v773_v7  ;;  %v775_v17 = vmul.f32 0.001, %v711_v8  ;;  %v713_v38 = vmul.f32 %v600_v34, %v521_v50  ;;  %v969_v21 = vpop.eup %968  ;;  %838 = vst [vmem:[#allocation9 + $0x58] sm:$0xff] %v774_v11  ;;  %v606_v49 = vmul.f32 0.6931472, %v967_v14 }
  0x87   :  { %v776_v18 = vmul.f32 0.001, %v712_v37  ;;  %v714_v41 = vmul.f32 %v602_v44, %v522_v55  ;;  %v1379_v25 = vadd.f32 1e-10, %v402_v40  ;;  %v971_v26 = vpop.eup %970  ;;  %v715_v42 = vmul.f32 %v604_v45, %v523_v60  ;;  %v405_v55 = vld [vmem:[#allocation7 + $0xd0] sm:$0xff]  ;;  %v407_v60 = vld [vmem:[#allocation7 + $0xe0] sm:$0xff] }
  0x88   :  { %839 = vst [vmem:[#allocation9 + $0x60] sm:$0xff] %v775_v17  ;;  %v777_v30 = vmul.f32 0.001, %v713_v38  ;;  %v608_v50 = vmul.f32 0.6931472, %v969_v21  ;;  %v716_v31 = vmul.f32 %v606_v49, %v524_v48  ;;  %v527_v46 = vsub.f32 0.0, %v1334_v6 }
  0x89   :  { %v1383_v5 = vadd.f32 1e-10, %v403_v61  ;;  %840 = vst [vmem:[#allocation9 + $0x68] sm:$0xff] %v776_v18  ;;  %v778_v19 = vmul.f32 0.001, %v714_v41  ;;  %v973_v22 = vpop.eup %972  ;;  %v528_v12 = vsub.f32 0.0, %v1359_v59  ;;  %978 = vlog2.f32 %v1379_v25 }
  0x8a   :  { %v610_v9 = vmul.f32 0.6931472, %v971_v26  ;;  %841 = vst [vmem:[#allocation9 + $0x70] sm:$0xff] %v777_v30  ;;  %v779_v35 = vmul.f32 0.001, %v715_v42  ;;  %v717_v39 = vmul.f32 %v608_v50, %v525_v36  ;;  %v408_v6 = vld [vmem:[#allocation7 + $0xe8] sm:$0xff] }
  0x8b   :  { %842 = vst [vmem:[#allocation9 + $0x78] sm:$0xff] %v778_v19  ;;  %v780_v23 = vmul.f32 0.001, %v716_v31  ;;  %v612_v47 = vmul.f32 0.6931472, %v973_v22  ;;  %980 = vlog2.f32 %v1383_v5  ;;  %v409_v15 = vld [vmem:[#allocation7 + $0xf0] sm:$0xff] }
  0x8c   :  { %v718_v43 = vmul.f32 %v610_v9, %v526_v13  ;;  %843 = vst [vmem:[#allocation9 + $0x80] sm:$0xff] %v779_v35  ;;  %v781_v27 = vmul.f32 0.001, %v717_v39  ;;  %v1391_v48 = vadd.f32 1e-10, %v404_v1  ;;  %v529_v58 = vsub.f32 0.0, %v1363_v33 }
  0x8d   :  { %v1393_v52 = vadd.f32 1e-10, %v405_v55  ;;  %844 = vst [vmem:[#allocation9 + $0x88] sm:$0xff] %v780_v23  ;;  %v719_v54 = vmul.f32 %v612_v47, %v527_v46  ;;  %v1395_v16 = vadd.f32 1e-10, %v406_v51  ;;  %v975_v57 = vpop.eup %974  ;;  %v530_v20 = vsub.f32 0.0, %v1379_v25 }
  0x8e   :  { %v782_v53 = vmul.f32 0.001, %v718_v43  ;;  %v1397_v28 = vadd.f32 1e-10, %v407_v60  ;;  %845 = vst [vmem:[#allocation9 + $0x90] sm:$0xff] %v781_v27  ;;  %982 = vlog2.f32 %v1391_v48  ;;  %v410_v59 = vld [vmem:[#allocation7 + $0xf8] sm:$0xff] }
  0x8f   :  { %v1402_v32 = vadd.f32 1e-10, %v408_v6  ;;  %v411_v56 = vld [vmem:[#allocation7 + $0x100] sm:$0xff]  ;;  %v783_v62 = vmul.f32 0.001, %v719_v54  ;;  %v531_v24 = vsub.f32 0.0, %v1383_v5  ;;  %984 = vlog2.f32 %v1393_v52  ;;  %v977_v2 = vpop.eup %976 }
  0x90   :  { %846 = vst [vmem:[#allocation9 + $0x98] sm:$0xff] %v782_v53  ;;  %v614_v63 = vmul.f32 0.6931472, %v975_v57  ;;  %v412_v0 = vld [vmem:[#allocation7 + $0x108] sm:$0xff]  ;;  %v532_v33 = vsub.f32 0.0, %v1391_v48  ;;  %v533_v3 = vsub.f32 0.0, %v1393_v52  ;;  %986 = vlog2.f32 %v1395_v16 }
  0x91   :  { %v1409_v29 = vadd.f32 1e-10, %v409_v15  ;;  %847 = vst [vmem:[#allocation9 + $0xa0] sm:$0xff] %v783_v62  ;;  %v616_v4 = vmul.f32 0.6931472, %v977_v2  ;;  %988 = vlog2.f32 %v1397_v28  ;;  %v413_v8 = vld [vmem:[#allocation7 + $0x110] sm:$0xff] }
  0x92   :  { %v720_v36 = vmul.f32 %v614_v63, %v528_v12  ;;  %v1415_v7 = vadd.f32 1e-10, %v410_v59  ;;  %v534_v34 = vsub.f32 0.0, %v1395_v16  ;;  %990 = vlog2.f32 %v1402_v32  ;;  %v414_v11 = vld [vmem:[#allocation7 + $0x118] sm:$0xff]  ;;  %v415_v61 = vld [vmem:[#allocation7 + $0x120] sm:$0xff] }
  0x93   :  { %v1419_v40 = vadd.f32 1e-10, %v411_v56  ;;  %v1421_v10 = vadd.f32 1e-10, %v412_v0  ;;  %v721_v44 = vmul.f32 %v616_v4, %v529_v58  ;;  %v535_v13 = vsub.f32 0.0, %v1397_v28 }
  0x94   :  { %v784_v37 = vmul.f32 0.001, %v720_v36  ;;  %992 = vlog2.f32 %v1409_v29 }
  0x95   :  { %1137 = shalt.err (!%p1134_p0)
}
  0x96   :  { %s1138_s5 = scalar_lea.hbm %s1615_s3, 8192 }
  0x97   :  { %p1139_p1 = scmp.ne.s32.totalorder %s1615_s3, %s1138_s5  ;;  %p1142_p2 = scmp.lt.u32.totalorder %s1138_s5, %s1615_s3 }
  0x99   :  { %p1144_p3 = pnand %p1142_p2, %p1139_p1 }
  0x9b   :  { %1147 = shalt.err (!%p1144_p3)
}
  0x9c   :  { %902 = dma.vmem_to_hbm [thread:$0]  %s1412_s25, 8192, %s1615_s3, [#allocation4], %s1180_s27, %s1180_s27, %s1181_s28   ;;  %v979_v14 = vpop.eup %978  ;;  %v536_v17 = vsub.f32 0.0, %v1402_v32  ;;  %v537_v38 = vsub.f32 0.0, %v1409_v29  ;;  %994 = vlog2.f32 %v1415_v7  ;;  %v1448_v45 = vadd.f32 1e-10, %v413_v8 }
  0x9d   :  { %v416_v21 = vld [vmem:[#allocation7 + $0x128] sm:$0xff]  ;;  %v417_v18 = vld [vmem:[#allocation7 + $0x130] sm:$0xff]  ;;  %v981_v41 = vpop.eup %980  ;;  %848 = vst [vmem:[#allocation9 + $0xa8] sm:$0xff] %v784_v37  ;;  %v785_v49 = vmul.f32 0.001, %v721_v44  ;;  %996 = vlog2.f32 %v1419_v40  ;;  %v538_v42 = vsub.f32 0.0, %v1415_v7 }
  0x9e   :  { %v618_v1 = vmul.f32 0.6931472, %v979_v14  ;;  %v1451_v26 = vadd.f32 1e-10, %v414_v11  ;;  %v620_v30 = vmul.f32 0.6931472, %v981_v41  ;;  %998 = vlog2.f32 %v1421_v10  ;;  %v983_v9 = vpop.eup %982 }
  0x9f   :  { %v1455_v50 = vadd.f32 1e-10, %v415_v61  ;;  %849 = vst [vmem:[#allocation9 + $0xb0] sm:$0xff] %v785_v49  ;;  %v539_v19 = vsub.f32 0.0, %v1419_v40  ;;  %1000 = vlog2.f32 %v1448_v45  ;;  %v1461_v31 = vadd.f32 1e-10, %v416_v21  ;;  %v985_v39 = vpop.eup %984 }
  0xa0   :  { %v722_v5 = vmul.f32 %v618_v1, %v530_v20  ;;  %v723_v46 = vmul.f32 %v620_v30, %v531_v24  ;;  %v540_v55 = vsub.f32 0.0, %v1421_v10  ;;  %1002 = vlog2.f32 %v1451_v26  ;;  %v418_v35 = vld [vmem:[#allocation7 + $0x138] sm:$0xff]  ;;  %v419_v60 = vld [vmem:[#allocation7 + $0x140] sm:$0xff]  ;;  %v987_v23 = vpop.eup %986  ;;  %v420_v15 = vld [vmem:[#allocation7 + $0x148] sm:$0xff]  ;;  %s1184_s3 = smov [#allocation9]  }
  0xa1   :  { %v1465_v22 = vadd.f32 1e-10, %v417_v18  ;;  %v622_v51 = vmul.f32 0.6931472, %v983_v9  ;;  %v541_v25 = vsub.f32 0.0, %v1448_v45  ;;  %1004 = vlog2.f32 %v1455_v50  ;;  %v989_v27 = vpop.eup %988  ;;  %v422_v41 = vld [vmem:[#allocation7 + $0x158] sm:$0xff] }
  0xa2   :  { %v786_v12 = vmul.f32 0.001, %v722_v5  ;;  %v787_v43 = vmul.f32 0.001, %v723_v46  ;;  %v624_v47 = vmul.f32 0.6931472, %v985_v39  ;;  %1006 = vlog2.f32 %v1461_v31  ;;  %v991_v58 = vpop.eup %990 }
  0xa3   :  { %v542_v6 = vsub.f32 0.0, %v1451_v26  ;;  %v724_v53 = vmul.f32 %v622_v51, %v532_v33  ;;  %v626_v54 = vmul.f32 0.6931472, %v987_v23  ;;  %1008 = vlog2.f32 %v1465_v22  ;;  %v993_v63 = vpop.eup %992  ;;  %v424_v51 = vld [vmem:[#allocation7 + $0x168] sm:$0xff]  ;;  %v425_v45 = vld [vmem:[#allocation7 + $0x170] sm:$0xff]  ;;  %v426_v26 = vld [vmem:[#allocation7 + $0x178] sm:$0xff] }
  0xa4   :  { %850 = vst [vmem:[#allocation9 + $0xb8] sm:$0xff] %v786_v12  ;;  %v1474_v57 = vadd.f32 1e-10, %v418_v35  ;;  %851 = vst [vmem:[#allocation9 + $0xc0] sm:$0xff] %v787_v43  ;;  %v725_v20 = vmul.f32 %v624_v47, %v533_v3  ;;  %v628_v59 = vmul.f32 0.6931472, %v989_v27 }
  0xa5   :  { %v543_v56 = vsub.f32 0.0, %v1455_v50  ;;  %v1479_v62 = vadd.f32 1e-10, %v419_v60  ;;  %v788_v24 = vmul.f32 0.001, %v724_v53  ;;  %v726_v48 = vmul.f32 %v626_v54, %v534_v34  ;;  %v428_v27 = vld [vmem:[#allocation7 + $0x188] sm:$0xff] }
  0xa6   :  { %v630_v0 = vmul.f32 0.6931472, %v991_v58  ;;  %v1483_v2 = vadd.f32 1e-10, %v420_v15  ;;  %v995_v33 = vpop.eup %994  ;;  %v789_v36 = vmul.f32 0.001, %v725_v20  ;;  %v727_v4 = vmul.f32 %v628_v59, %v535_v13 }
  0xa7   :  { %v632_v52 = vmul.f32 0.6931472, %v993_v63  ;;  %1010 = vlog2.f32 %v1474_v57  ;;  %v997_v3 = vpop.eup %996  ;;  %852 = vst [vmem:[#allocation9 + $0xc8] sm:$0xff] %v788_v24  ;;  %v790_v8 = vmul.f32 0.001, %v726_v48  ;;  %v544_v16 = vsub.f32 0.0, %v1461_v31 }
  0xa8   :  { %v728_v11 = vmul.f32 %v630_v0, %v536_v17  ;;  %v634_v37 = vmul.f32 0.6931472, %v995_v33  ;;  %v999_v34 = vpop.eup %998  ;;  %853 = vst [vmem:[#allocation9 + $0xd0] sm:$0xff] %v789_v36  ;;  %v791_v44 = vmul.f32 0.001, %v727_v4  ;;  %1012 = vlog2.f32 %v1479_v62  ;;  %v421_v13 = vld [vmem:[#allocation7 + $0x150] sm:$0xff] }
  0xa9   :  { %v729_v61 = vmul.f32 %v632_v52, %v537_v38  ;;  %v636_v28 = vmul.f32 0.6931472, %v997_v3  ;;  %v1001_v14 = vpop.eup %1000  ;;  %854 = vst [vmem:[#allocation9 + $0xd8] sm:$0xff] %v790_v8  ;;  %v638_v17 = vmul.f32 0.6931472, %v999_v34  ;;  %v545_v18 = vsub.f32 0.0, %v1465_v22 }
  0xaa   :  { %v792_v21 = vmul.f32 0.001, %v728_v11  ;;  %v730_v32 = vmul.f32 %v634_v37, %v538_v42  ;;  %v1003_v49 = vpop.eup %1002  ;;  %855 = vst [vmem:[#allocation9 + $0xe0] sm:$0xff] %v791_v44  ;;  %v640_v38 = vmul.f32 0.6931472, %v1001_v14  ;;  %1014 = vlog2.f32 %v1483_v2  ;;  %v423_v31 = vld [vmem:[#allocation7 + $0x160] sm:$0xff] }
  0xab   :  { %v793_v1 = vmul.f32 0.001, %v729_v61  ;;  %v731_v29 = vmul.f32 %v636_v28, %v539_v19  ;;  %v1005_v30 = vpop.eup %1004  ;;  %v732_v7 = vmul.f32 %v638_v17, %v540_v55  ;;  %v642_v42 = vmul.f32 0.6931472, %v1003_v49  ;;  %v429_v33 = vld [vmem:[#allocation7 + $0x190] sm:$0xff]  ;;  %v430_v3 = vld [vmem:[#allocation7 + $0x198] sm:$0xff] }
  0xac   :  { %856 = vst [vmem:[#allocation9 + $0xe8] sm:$0xff] %v792_v21  ;;  %v794_v50 = vmul.f32 0.001, %v730_v32  ;;  %v1502_v5 = vadd.f32 1e-10, %v421_v13  ;;  %v1007_v9 = vpop.eup %1006  ;;  %v733_v40 = vmul.f32 %v640_v38, %v541_v25  ;;  %v546_v12 = vsub.f32 0.0, %v1474_v57 }
  0xad   :  { %857 = vst [vmem:[#allocation9 + $0xf0] sm:$0xff] %v793_v1  ;;  %v795_v46 = vmul.f32 0.001, %v731_v29  ;;  %v644_v19 = vmul.f32 0.6931472, %v1005_v30  ;;  %v1009_v35 = vpop.eup %1008  ;;  %v734_v10 = vmul.f32 %v642_v42, %v542_v6  ;;  %v547_v15 = vsub.f32 0.0, %v1479_v62 }
  0xae   :  { %v1506_v22 = vadd.f32 1e-10, %v422_v41  ;;  %858 = vst [vmem:[#allocation9 + $0xf8] sm:$0xff] %v794_v50  ;;  %v796_v39 = vmul.f32 0.001, %v732_v7  ;;  %1016 = vlog2.f32 %v1502_v5  ;;  %v427_v6 = vld [vmem:[#allocation7 + $0x180] sm:$0xff] }
  0xaf   :  { %v646_v55 = vmul.f32 0.6931472, %v1007_v9  ;;  %859 = vst [vmem:[#allocation9 + $0x100] sm:$0xff] %v795_v46  ;;  %v797_v60 = vmul.f32 0.001, %v733_v40  ;;  %v735_v23 = vmul.f32 %v644_v19, %v543_v56  ;;  %v548_v48 = vsub.f32 0.0, %v1483_v2 }
  0xb0   :  { %v648_v43 = vmul.f32 0.6931472, %v1009_v35  ;;  %860 = vst [vmem:[#allocation9 + $0x108] sm:$0xff] %v796_v39  ;;  %v798_v25 = vmul.f32 0.001, %v734_v10  ;;  %1018 = vlog2.f32 %v1506_v22  ;;  %v549_v0 = vsub.f32 0.0, %v1502_v5 }
  0xb1   :  { %v736_v47 = vmul.f32 %v646_v55, %v544_v16  ;;  %v1011_v53 = vpop.eup %1010  ;;  %861 = vst [vmem:[#allocation9 + $0x110] sm:$0xff] %v797_v60  ;;  %v799_v54 = vmul.f32 0.001, %v735_v23  ;;  %v1514_v58 = vadd.f32 1e-10, %v423_v31  ;;  %v550_v52 = vsub.f32 0.0, %v1506_v22 }
  0xb2   :  { %v737_v57 = vmul.f32 %v648_v43, %v545_v18  ;;  %v1516_v20 = vadd.f32 1e-10, %v424_v51  ;;  %862 = vst [vmem:[#allocation9 + $0x118] sm:$0xff] %v798_v25  ;;  %v650_v56 = vmul.f32 0.6931472, %v1011_v53  ;;  %v1013_v24 = vpop.eup %1012  ;;  %v431_v8 = vld [vmem:[#allocation7 + $0x1a0] sm:$0xff] }
  0xb3   :  { %v800_v59 = vmul.f32 0.001, %v736_v47  ;;  %v1518_v63 = vadd.f32 1e-10, %v425_v45  ;;  %863 = vst [vmem:[#allocation9 + $0x120] sm:$0xff] %v799_v54  ;;  %1020 = vlog2.f32 %v1514_v58  ;;  %v432_v11 = vld [vmem:[#allocation7 + $0x1a8] sm:$0xff] }
  0xb4   :  { %v801_v62 = vmul.f32 0.001, %v737_v57  ;;  %v738_v36 = vmul.f32 %v650_v56, %v546_v12  ;;  %v652_v4 = vmul.f32 0.6931472, %v1013_v24  ;;  %1022 = vlog2.f32 %v1516_v20  ;;  %v1015_v37 = vpop.eup %1014  ;;  %v433_v17 = vld [vmem:[#allocation7 + $0x1b0] sm:$0xff]  ;;  %v434_v1 = vld [vmem:[#allocation7 + $0x1b8] sm:$0xff] }
  0xb5   :  { %864 = vst [vmem:[#allocation9 + $0x128] sm:$0xff] %v800_v59  ;;  %1024 = vlog2.f32 %v1518_v63  ;;  %v1526_v2 = vadd.f32 1e-10, %v426_v26  ;;  %v1528_v16 = vadd.f32 1e-10, %v427_v6  ;;  %v551_v14 = vsub.f32 0.0, %v1514_v58 }
  0xb6   :  { %865 = vst [vmem:[#allocation9 + $0x130] sm:$0xff] %v801_v62  ;;  %v1530_v34 = vadd.f32 1e-10, %v428_v27  ;;  %v802_v44 = vmul.f32 0.001, %v738_v36  ;;  %v739_v61 = vmul.f32 %v652_v4, %v547_v15  ;;  %v552_v21 = vsub.f32 0.0, %v1516_v20 }
  0xb7   :  { %v654_v28 = vmul.f32 0.6931472, %v1015_v37  ;;  %v1532_v13 = vadd.f32 1e-10, %v429_v33  ;;  %v553_v32 = vsub.f32 0.0, %v1518_v63  ;;  %1026 = vlog2.f32 %v1526_v2  ;;  %v435_v29 = vld [vmem:[#allocation7 + $0x1c0] sm:$0xff] }
  0xb8   :  { %866 = vst [vmem:[#allocation9 + $0x138] sm:$0xff] %v802_v44  ;;  %v803_v18 = vmul.f32 0.001, %v739_v61  ;;  %v554_v49 = vsub.f32 0.0, %v1526_v2  ;;  %1028 = vlog2.f32 %v1528_v16  ;;  %v1017_v38 = vpop.eup %1016  ;;  %v1541_v30 = vadd.f32 1e-10, %v430_v3 }
  0xb9   :  { %v740_v41 = vmul.f32 %v654_v28, %v548_v48  ;;  %1030 = vlog2.f32 %v1530_v34  ;;  %v1543_v50 = vadd.f32 1e-10, %v431_v8  ;;  %v1545_v7 = vadd.f32 1e-10, %v432_v11  ;;  %v436_v22 = vld [vmem:[#allocation7 + $0x1c8] sm:$0xff]  ;;  %v437_v23 = vld [vmem:[#allocation7 + $0x1d0] sm:$0xff] }
  0xba   :  { %v1019_v42 = vpop.eup %1018  ;;  %867 = vst [vmem:[#allocation9 + $0x140] sm:$0xff] %v803_v18  ;;  %v656_v31 = vmul.f32 0.6931472, %v1017_v38  ;;  %1032 = vlog2.f32 %v1532_v13  ;;  %v1548_v9 = vadd.f32 1e-10, %v433_v17  ;;  %v555_v40 = vsub.f32 0.0, %v1528_v16 }
  0xbb   :  { %v804_v5 = vmul.f32 0.001, %v740_v41  ;;  %v658_v46 = vmul.f32 0.6931472, %v1019_v42  ;;  %v556_v19 = vsub.f32 0.0, %v1530_v34  ;;  %1034 = vlog2.f32 %v1541_v30  ;;  %v438_v53 = vld [vmem:[#allocation7 + $0x1d8] sm:$0xff] }
  0xbc   :  { %v741_v35 = vmul.f32 %v656_v31, %v549_v0  ;;  %v557_v39 = vsub.f32 0.0, %v1532_v13  ;;  %v558_v10 = vsub.f32 0.0, %v1541_v30  ;;  %1036 = vlog2.f32 %v1543_v50  ;;  %v439_v24 = vld [vmem:[#allocation7 + $0x1e0] sm:$0xff]  ;;  %v440_v11 = vld [vmem:[#allocation7 + $0x1e8] sm:$0xff]  ;;  %v441_v34 = vld [vmem:[#allocation7 + $0x1f0] sm:$0xff]  ;;  %s908_s12 = sshll.u32 %s1184_s3, 4  ;;  %s909_s12 = int_to_ptr.vmem [resolvable:$true] %s908_s12 }
  0xbd   :  { %868 = vst [vmem:[#allocation9 + $0x148] sm:$0xff] %v804_v5  ;;  %v1021_v55 = vpop.eup %1020  ;;  %v742_v12 = vmul.f32 %v658_v46, %v550_v52  ;;  %1038 = vlog2.f32 %v1545_v7  ;;  %v1557_v51 = vadd.f32 1e-10, %v434_v1  ;;  %v1559_v60 = vadd.f32 1e-10, %v435_v29  ;;  %s1148_s1 = scalar_lea.vmem %s909_s12, 8192  ;;  %p1153_p5 = scmp.lt.s32.totalorder %s909_s12, %s909_s12 }
  0xbe   :  { %v1023_v43 = vpop.eup %1022  ;;  %v805_v45 = vmul.f32 0.001, %v741_v35  ;;  %v660_v25 = vmul.f32 0.6931472, %v1021_v55  ;;  %1040 = vlog2.f32 %v1548_v9  ;;  %v1562_v47 = vadd.f32 1e-10, %v436_v22  ;;  %p1149_p4 = scmp.ne.s32.totalorder %s909_s12, %s1148_s1  ;;  %p1154_p6 = scmp.lt.s32.totalorder %s1148_s1, %s1148_s1 }
  0xbf   :  { %v1025_v15 = vpop.eup %1024  ;;  %v806_v26 = vmul.f32 0.001, %v742_v12  ;;  %v662_v6 = vmul.f32 0.6931472, %v1023_v43  ;;  %v559_v27 = vsub.f32 0.0, %v1543_v50  ;;  %1042 = vlog2.f32 %v1557_v51 }
  0xc0   :  { %869 = vst [vmem:[#allocation9 + $0x150] sm:$0xff] %v805_v45  ;;  %v743_v54 = vmul.f32 %v660_v25, %v551_v14  ;;  %v664_v57 = vmul.f32 0.6931472, %v1025_v15  ;;  %v560_v58 = vsub.f32 0.0, %v1545_v7  ;;  %1044 = vlog2.f32 %v1559_v60  ;;  %p1155_p7 = por %p1154_p6, %p1153_p5 }
  0xc1   :  { %v1027_v20 = vpop.eup %1026  ;;  %870 = vst [vmem:[#allocation9 + $0x158] sm:$0xff] %v806_v26  ;;  %v744_v59 = vmul.f32 %v662_v6, %v552_v21  ;;  %v561_v56 = vsub.f32 0.0, %v1548_v9  ;;  %1046 = vlog2.f32 %v1562_v47  ;;  %v1570_v63 = vadd.f32 1e-10, %v437_v23 }
  0xc2   :  { %v1029_v62 = vpop.eup %1028  ;;  %v807_v48 = vmul.f32 0.001, %v743_v54  ;;  %v745_v0 = vmul.f32 %v664_v57, %v553_v32  ;;  %v666_v33 = vmul.f32 0.6931472, %v1027_v20  ;;  %v1572_v36 = vadd.f32 1e-10, %v438_v53  ;;  %p1156_p8 = pnand %p1155_p7, %p1149_p4 }
  0xc3   :  { %v1031_v4 = vpop.eup %1030  ;;  %v808_v52 = vmul.f32 0.001, %v744_v59  ;;  %v668_v3 = vmul.f32 0.6931472, %v1029_v62  ;;  %v562_v8 = vsub.f32 0.0, %v1557_v51  ;;  %1048 = vlog2.f32 %v1570_v63 }
  0xc4   :  { %v1033_v37 = vpop.eup %1032  ;;  %871 = vst [vmem:[#allocation9 + $0x160] sm:$0xff] %v807_v48  ;;  %v809_v16 = vmul.f32 0.001, %v745_v0  ;;  %v746_v44 = vmul.f32 %v666_v33, %v554_v49  ;;  %v670_v61 = vmul.f32 0.6931472, %v1031_v4  ;;  %v563_v28 = vsub.f32 0.0, %v1559_v60 }
  0xc5   :  { %v1035_v14 = vpop.eup %1034  ;;  %872 = vst [vmem:[#allocation9 + $0x168] sm:$0xff] %v808_v52  ;;  %v747_v21 = vmul.f32 %v668_v3, %v555_v40  ;;  %v672_v32 = vmul.f32 0.6931472, %v1033_v37  ;;  %1050 = vlog2.f32 %v1572_v36  ;;  %v1580_v17 = vadd.f32 1e-10, %v439_v24 }
  0xc6   :  { %v1037_v18 = vpop.eup %1036  ;;  %873 = vst [vmem:[#allocation9 + $0x170] sm:$0xff] %v809_v16  ;;  %v810_v41 = vmul.f32 0.001, %v746_v44  ;;  %v748_v1 = vmul.f32 %v670_v61, %v556_v19  ;;  %v674_v29 = vmul.f32 0.6931472, %v1035_v14  ;;  %v564_v42 = vsub.f32 0.0, %v1562_v47 }
  0xc7   :  { %v1584_v2 = vadd.f32 1e-10, %v440_v11  ;;  %v1039_v49 = vpop.eup %1038  ;;  %v811_v38 = vmul.f32 0.001, %v747_v21  ;;  %v749_v50 = vmul.f32 %v672_v32, %v557_v39  ;;  %v676_v7 = vmul.f32 0.6931472, %v1037_v18 }
  0xc8   :  { %v1041_v5 = vpop.eup %1040  ;;  %874 = vst [vmem:[#allocation9 + $0x178] sm:$0xff] %v810_v41  ;;  %v812_v31 = vmul.f32 0.001, %v748_v1  ;;  %v750_v9 = vmul.f32 %v674_v29, %v558_v10  ;;  %v678_v46 = vmul.f32 0.6931472, %v1039_v49  ;;  %1052 = vlog2.f32 %v1580_v17  ;;  %v442_v39 = vld [vmem:[#allocation7 + $0x1f8] sm:$0xff] }
  0xc9   :  { %v1043_v40 = vpop.eup %1042  ;;  %875 = vst [vmem:[#allocation9 + $0x180] sm:$0xff] %v811_v38  ;;  %v813_v19 = vmul.f32 0.001, %v749_v50  ;;  %v751_v22 = vmul.f32 %v676_v7, %v559_v27  ;;  %v680_v35 = vmul.f32 0.6931472, %v1041_v5  ;;  %v565_v13 = vsub.f32 0.0, %v1570_v63 }
  0xca   :  { %v1045_v55 = vpop.eup %1044  ;;  %876 = vst [vmem:[#allocation9 + $0x188] sm:$0xff] %v812_v31  ;;  %v814_v12 = vmul.f32 0.001, %v750_v9  ;;  %v752_v51 = vmul.f32 %v678_v46, %v560_v58  ;;  %v682_v60 = vmul.f32 0.6931472, %v1043_v40  ;;  %1054 = vlog2.f32 %v1584_v2 }
  0xcb   :  { %v1047_v30 = vpop.eup %1046  ;;  %877 = vst [vmem:[#allocation9 + $0x190] sm:$0xff] %v813_v19  ;;  %v815_v10 = vmul.f32 0.001, %v751_v22  ;;  %v753_v23 = vmul.f32 %v680_v35, %v561_v56  ;;  %v684_v43 = vmul.f32 0.6931472, %v1045_v55  ;;  %v566_v20 = vsub.f32 0.0, %v1572_v36 }
  0xcc   :  { %v505_v45 = vadd.f32 1e-10, %v441_v34  ;;  %878 = vst [vmem:[#allocation9 + $0x198] sm:$0xff] %v814_v12  ;;  %v816_v25 = vmul.f32 0.001, %v752_v51  ;;  %v754_v47 = vmul.f32 %v682_v60, %v562_v8  ;;  %v567_v48 = vsub.f32 0.0, %v1580_v17 }
  0xcd   :  { %v686_v15 = vmul.f32 0.6931472, %v1047_v30  ;;  %v506_v26 = vadd.f32 1e-10, %v442_v39  ;;  %v1049_v6 = vpop.eup %1048  ;;  %879 = vst [vmem:[#allocation9 + $0x1a0] sm:$0xff] %v815_v10  ;;  %v755_v53 = vmul.f32 %v684_v43, %v563_v28  ;;  %v568_v3 = vsub.f32 0.0, %v1584_v2 }
  0xce   :  { %v817_v27 = vmul.f32 0.001, %v753_v23  ;;  %1056 = vlog2.f32 %v505_v45  ;;  %880 = vst [vmem:[#allocation9 + $0x1a8] sm:$0xff] %v816_v25  ;;  %v818_v54 = vmul.f32 0.001, %v754_v47  ;;  %v569_v16 = vsub.f32 0.0, %v505_v45 }
  0xcf   :  { %v756_v57 = vmul.f32 %v686_v15, %v564_v42  ;;  %v688_v58 = vmul.f32 0.6931472, %v1049_v6  ;;  %v1051_v59 = vpop.eup %1050  ;;  %v819_v56 = vmul.f32 0.001, %v755_v53  ;;  %1058 = vlog2.f32 %v506_v26 }
  0xd0   :  { %881 = vst [vmem:[#allocation9 + $0x1b0] sm:$0xff] %v817_v27  ;;  %882 = vst [vmem:[#allocation9 + $0x1b8] sm:$0xff] %v818_v54  ;;  %v690_v62 = vmul.f32 0.6931472, %v1051_v59  ;;  %v570_v21 = vsub.f32 0.0, %v506_v26 }
  0xd1   :  { %v820_v63 = vmul.f32 0.001, %v756_v57  ;;  %v757_v24 = vmul.f32 %v688_v58, %v565_v13  ;;  %883 = vst [vmem:[#allocation9 + $0x1c0] sm:$0xff] %v819_v56 }
  0xd2   :  { %v1053_v0 = vpop.eup %1052  ;;  %v758_v4 = vmul.f32 %v690_v62, %v566_v20 }
  0xd3   :  { %884 = vst [vmem:[#allocation9 + $0x1c8] sm:$0xff] %v820_v63  ;;  %v821_v33 = vmul.f32 0.001, %v757_v24  ;;  %v692_v52 = vmul.f32 0.6931472, %v1053_v0 }
  0xd4   :  { %v1055_v8 = vpop.eup %1054  ;;  %v822_v36 = vmul.f32 0.001, %v758_v4 }
  0xd5   :  { %885 = vst [vmem:[#allocation9 + $0x1d0] sm:$0xff] %v821_v33  ;;  %v759_v11 = vmul.f32 %v692_v52, %v567_v48  ;;  %v694_v37 = vmul.f32 0.6931472, %v1055_v8 }
  0xd6   :  { %886 = vst [vmem:[#allocation9 + $0x1d8] sm:$0xff] %v822_v36 }
  0xd7   :  { %v823_v61 = vmul.f32 0.001, %v759_v11  ;;  %v760_v28 = vmul.f32 %v694_v37, %v568_v3 }
  0xd8   :  { %v1057_v44 = vpop.eup %1056 }
  0xd9   :  { %v696_v14 = vmul.f32 0.6931472, %v1057_v44  ;;  %v1059_v32 = vpop.eup %1058  ;;  %887 = vst [vmem:[#allocation9 + $0x1e0] sm:$0xff] %v823_v61  ;;  %v824_v17 = vmul.f32 0.001, %v760_v28 }
  0xda   :  { %v698_v41 = vmul.f32 0.6931472, %v1059_v32 }
  0xdb   :  { %v761_v18 = vmul.f32 %v696_v14, %v569_v16  ;;  %888 = vst [vmem:[#allocation9 + $0x1e8] sm:$0xff] %v824_v17 }
  0xdc   :  { %v762_v29 = vmul.f32 %v698_v41, %v570_v21 }
  0xdd   :  { %v825_v1 = vmul.f32 0.001, %v761_v18 }
  0xde   :  { %v826_v2 = vmul.f32 0.001, %v762_v29 }
  0xdf   :  { %889 = vst [vmem:[#allocation9 + $0x1f0] sm:$0xff] %v825_v1 }
  0xe0   :  { %890 = vst [vmem:[#allocation9 + $0x1f8] sm:$0xff] %v826_v2 }
  0xe1   :  { %1159 = shalt.err (!%p1156_p8)
}
  0xe2   :  { %s1160_s15 = scalar_lea.hbm %s1616_s4, 8192 }
  0xe3   :  { %p1161_p9 = scmp.ne.s32.totalorder %s1616_s4, %s1160_s15  ;;  %p1164_p10 = scmp.lt.u32.totalorder %s1160_s15, %s1616_s4 }
  0xe5   :  { %p1166_p11 = pnand %p1164_p10, %p1161_p9 }
  0xe7   :  { %1169 = shalt.err (!%p1166_p11)
}
  0xe8   :  { %914 = dma.vmem_to_hbm [thread:$0]  %s909_s12, 8192, %s1616_s4, [#allocation10], %s1180_s27, %s1180_s27, %s1181_s28  }
  0xe9   :  { %1174 = dma.done.wait [#allocation4], 8192  }
  0xea   :  { %1175 = vsyncadd [#allocation4], 4294959104 }
  0xeb   :  { %1176 = dma.done.wait [#allocation10], 8192  }
  0xec   :  { %1177 = vsyncadd [#allocation10], 4294959104 }
  0xed   :  { %921 = vsyncpa [#allocation3], 1 }
  0xee   :  { %922 = vsyncpa [#allocation6], 1 }
  0xef   :  { %923 = vsyncpa [#allocation4], 1 }
  0xf0   :  { %924 = vsyncpa [#allocation10], 1 }

</bundles_post_ra>
